<compile_context>
chip_gen: v6e
topology: v6e:2x2x1
jax: 0.10.0
libtpu: 0.0.40
codegen_flags: <defaults>
</compile_context>

<pallas_src>
import functools

import jax
import jax.numpy as jnp
from jax.experimental import pallas as pl
from jax.experimental.pallas import tpu as pltpu


def fcnet_kernel(x_ref,
                 w1_ref, b1_ref, w2_ref, b2_ref,
                 w3_ref, b3_ref, w4_ref, b4_ref,
                 o_ref,
                 *, L, TB, act_dtype):
    l1 = L - 2      # conv1 output length
    l2 = l1 - 2     # max_pool1 output length
    l3 = l2 - 2     # conv2 output length
    l4 = l3 - 2     # max_pool2 output length

    def conv_k3(h, w_ref, b_ref, lout):
        # kernel_size=3 conv as 3 accumulating MXU matmuls on lane-aligned
        # shifted slices (tap t starts at lane offset t*TB).  No scratch.
        acc = jnp.dot(w_ref[0], h[:, 0:lout * TB],
                      preferred_element_type=jnp.float32)
        for t in range(1, 3):
            acc = acc + jnp.dot(w_ref[t], h[:, t * TB:(t + lout) * TB],
                                preferred_element_type=jnp.float32)
        return acc + b_ref[...]            # (Cout, 1) broadcast over lanes

    def conv_k1(h, w_ref, b_ref):
        return jnp.dot(w_ref[...], h,
                       preferred_element_type=jnp.float32) + b_ref[...]

    def maxpool3(h, lout):
        out = jnp.maximum(h[:, 0:lout * TB], h[:, TB:(1 + lout) * TB])
        return jnp.maximum(out, h[:, 2 * TB:(2 + lout) * TB])

    x = x_ref[...]                                                   # (3, L*TB) bf16
    h = jnp.tanh(conv_k3(x, w1_ref, b1_ref, l1).astype(act_dtype))   # (10, l1*TB)
    h = maxpool3(h, l2)                                              # (10, l2*TB)
    h = jnp.tanh(conv_k3(h, w2_ref, b2_ref, l3).astype(act_dtype))   # (20, l3*TB)
    h = maxpool3(h, l4)                                              # (20, l4*TB)
    h = jnp.tanh(conv_k1(h, w3_ref, b3_ref).astype(act_dtype))       # (40, l4*TB)
    h = jax.nn.relu(conv_k1(h, w4_ref, b4_ref))                      # (25, l4*TB) f32

    # Sum over length positions: log-depth tree of lane-aligned TB-wide adds.
    parts = [h[:, t * TB:(t + 1) * TB] for t in range(l4)]
    while len(parts) > 1:
        nxt = [parts[i] + parts[i + 1] for i in range(0, len(parts) - 1, 2)]
        if len(parts) % 2:
            nxt.append(parts[-1])
        parts = nxt
    o_ref[...] = parts[0]                                            # (25, TB) f32


def _round_up(n, m):
    return ((n + m - 1) // m) * m


def fcnet_forward(x, params, *, tb=1024, act_dtype=jnp.bfloat16):
    # x: (N, 3, L) float32 -> (N, 25) float32
    N, C, L = x.shape
    assert L >= 9, "need L >= 9 for the conv/pool stack"
    w1, b1, w2, b2, w3, b3, w4, b4 = params
    cout_final = w4.shape[0]                # 25

    # Batch tile: multiple of 128, no larger than the (padded) batch.
    tb = max(128, min(tb, _round_up(N, 128)))
    num_tiles = pl.cdiv(N, tb)
    n_pad = num_tiles * tb

    # Tap-major per-tap weights: (Cout, Cin, 3) -> (3, Cout, Cin), bf16.
    def tap_major(w):
        return jnp.transpose(w, (2, 0, 1)).astype(jnp.bfloat16)

    w1t, w2t = tap_major(w1), tap_major(w2)
    w3m = w3[:, :, 0].astype(jnp.bfloat16)  # (40, 20)
    w4m = w4[:, :, 0].astype(jnp.bfloat16)  # (25, 40)
    weight_args = (w1t, b1, w2t, b2, w3m, b3, w4m, b4)

    # Cast to bf16 BEFORE the repack (halves the transpose pass's HBM bytes),
    # then pack the batch onto the lane axis:
    # (N, C, L) -> (num_tiles, C, L*tb), column l*tb + b = (sample b, pos l).
    # TODO(synk): for large N fuse this repack into the producer of x so it is
    # not a separate full-HBM pass.
    xp = x.astype(jnp.bfloat16)
    if n_pad != N:
        xp = jnp.zeros((n_pad, C, L), jnp.bfloat16).at[:N].set(xp)
    xp = xp.reshape(num_tiles, tb, C, L).transpose(0, 2, 3, 1)
    xp = xp.reshape(num_tiles, C, L * tb)

    in_specs = [pl.BlockSpec((None, C, L * tb), lambda n: (n, 0, 0))]
    # Small weights/biases: constant index maps keep them VMEM-resident.
    in_specs += [pl.BlockSpec(a.shape, (lambda n, _nd=a.ndim: (0,) * _nd))
                 for a in weight_args]
    out_spec = pl.BlockSpec((None, cout_final, tb), lambda n: (n, 0, 0))

    kernel = functools.partial(fcnet_kernel, L=L, TB=tb, act_dtype=act_dtype)

    out = pl.pallas_call(
        kernel,
        out_shape=jax.ShapeDtypeStruct((num_tiles, cout_final, tb), jnp.float32),
        grid_spec=pltpu.PrefetchScalarGridSpec(
            num_scalar_prefetch=0,
            grid=(num_tiles,),
            in_specs=in_specs,
            out_specs=out_spec,
        ),
        compiler_params=pltpu.CompilerParams(
            dimension_semantics=("parallel",)),
    )(xp, *weight_args)

    # (num_tiles, 25, tb) -> (N, 25)
    return out.transpose(0, 2, 1).reshape(n_pad, cout_final)[:N]


def fcnet_reference(x, params, act_dtype=jnp.bfloat16):
    """Pure-JAX reference using the same bf16-operand / f32-accumulation /
    bf16-activation scheme as the kernel."""
    w1, b1, w2, b2, w3, b3, w4, b4 = params

    def conv(h, w, b):
        out = jax.lax.conv_general_dilated(
            h.astype(jnp.bfloat16), w.astype(jnp.bfloat16),
            window_strides=(1,), padding="VALID",
            dimension_numbers=("NCH", "OIH", "NCH"),
            preferred_element_type=jnp.float32)
        return out + b[None, :, :]

    def maxpool(h, k):
        lout = h.shape[-1] - k + 1
        out = h[..., 0:lout]
        for t in range(1, k):
            out = jnp.maximum(out, h[..., t:t + lout])
        return out

    h = jnp.tanh(conv(x, w1, b1).astype(act_dtype))
    h = maxpool(h, 3)
    h = jnp.tanh(conv(h, w2, b2).astype(act_dtype))
    h = maxpool(h, 3)
    h = jnp.tanh(conv(h, w3, b3).astype(act_dtype))
    h = jax.nn.relu(conv(h, w4, b4))
    return jnp.sum(h.astype(jnp.float32), axis=2)


def init_params(key):
    """Deterministic PyTorch-style uniform init. Biases stored as (C, 1)."""
    defs = [
        (10, 3, 3),   # conv1
        (20, 10, 3),  # conv2
        (40, 20, 1),  # fconv1
        (25, 40, 1),  # fconv2
    ]
    params = []
    for (cout, cin, k) in defs:
        key, kw, kb = jax.random.split(key, 3)
        bound = 1.0 / jnp.sqrt(cin * k)
        w = jax.random.uniform(kw, (cout, cin, k), jnp.float32, -bound, bound)
        b = jax.random.uniform(kb, (cout, 1), jnp.float32, -bound, bound)
        params += [w, b]
    return tuple(params)


if __name__ == "__main__":
    key = jax.random.PRNGKey(0)
    kx, kp = jax.random.split(key)

    N, C_IN, L = 2, 3, 16     # small shapes consistent with Conv1d(in_channels=3, ...)
    x = jax.random.normal(kx, (N, C_IN, L), jnp.float32)
    params = init_params(kp)

    out = fcnet_forward(x, params)
    jax.block_until_ready(out)
    assert out.shape == (N, 25), out.shape

    ref = fcnet_reference(x, params)
    max_err = float(jnp.max(jnp.abs(out - ref)))
    assert max_err < 5e-2, f"max abs error vs reference: {max_err}"

    print("KERNEL_OK")
</pallas_src>

<mosaic_0001>
module attributes {stable_mosaic.version = 11 : i64} {
  func.func @fcnet_kernel(%arg0: i32, %arg1: memref<1x3x2048xbf16, #tpu.memory_space<vmem>>, %arg2: memref<3x10x3xbf16, #tpu.memory_space<vmem>>, %arg3: memref<10x1xf32, #tpu.memory_space<vmem>>, %arg4: memref<3x20x10xbf16, #tpu.memory_space<vmem>>, %arg5: memref<20x1xf32, #tpu.memory_space<vmem>>, %arg6: memref<40x20xbf16, #tpu.memory_space<vmem>>, %arg7: memref<40x1xf32, #tpu.memory_space<vmem>>, %arg8: memref<25x40xbf16, #tpu.memory_space<vmem>>, %arg9: memref<25x1xf32, #tpu.memory_space<vmem>>, %arg10: memref<1x25x128xf32, #tpu.memory_space<vmem>>) attributes {dimension_semantics = [#tpu.dimension_semantics<parallel>], iteration_bounds = array<i64: 1>, scalar_prefetch = 0 : i64, scratch_operands = 0 : i64, tpu.core_type = #tpu.core_type<tc>, window_params = [{transform_indices = @transform_0, window_bounds = array<i64: 1, 3, 2048>}, {pipeline_mode = #tpu.pipeline_mode<synchronous>, transform_indices = @transform_1, window_bounds = array<i64: 3, 10, 3>}, {pipeline_mode = #tpu.pipeline_mode<synchronous>, transform_indices = @transform_2, window_bounds = array<i64: 10, 1>}, {pipeline_mode = #tpu.pipeline_mode<synchronous>, transform_indices = @transform_3, window_bounds = array<i64: 3, 20, 10>}, {pipeline_mode = #tpu.pipeline_mode<synchronous>, transform_indices = @transform_4, window_bounds = array<i64: 20, 1>}, {pipeline_mode = #tpu.pipeline_mode<synchronous>, transform_indices = @transform_5, window_bounds = array<i64: 40, 20>}, {pipeline_mode = #tpu.pipeline_mode<synchronous>, transform_indices = @transform_6, window_bounds = array<i64: 40, 1>}, {pipeline_mode = #tpu.pipeline_mode<synchronous>, transform_indices = @transform_7, window_bounds = array<i64: 25, 40>}, {pipeline_mode = #tpu.pipeline_mode<synchronous>, transform_indices = @transform_8, window_bounds = array<i64: 25, 1>}, {transform_indices = @transform_9, window_bounds = array<i64: 1, 25, 128>}]} {
    %c0 = arith.constant 0 : index
    %c0_0 = arith.constant 0 : index
    %c0_1 = arith.constant 0 : index
    %0 = vector.load %arg1[%c0, %c0_0, %c0_1] : memref<1x3x2048xbf16, #tpu.memory_space<vmem>>, vector<1x3x2048xbf16>
    %1 = vector.shape_cast %0 : vector<1x3x2048xbf16> to vector<3x2048xbf16>
    %c0_2 = arith.constant 0 : index
    %c0_3 = arith.constant 0 : index
    %c0_4 = arith.constant 0 : index
    %2 = vector.load %arg2[%c0_2, %c0_3, %c0_4] : memref<3x10x3xbf16, #tpu.memory_space<vmem>>, vector<1x10x3xbf16>
    %3 = vector.shape_cast %2 : vector<1x10x3xbf16> to vector<10x3xbf16>
    %4 = vector.extract_strided_slice %1 {offsets = [0, 0], sizes = [3, 1792], strides = [1, 1]} : vector<3x2048xbf16> to vector<3x1792xbf16>
    %cst = arith.constant dense<0.000000e+00> : vector<10x1792xf32>
    %5 = tpu.matmul %3, %4, %cst {dimension_numbers = #tpu.dot_dimension_numbers<[1], [0], [0], [1], [0, 0, 1, 1], [], []>} : vector<10x3xbf16>, vector<3x1792xbf16>, vector<10x1792xf32> -> vector<10x1792xf32>
    %c1 = arith.constant 1 : index
    %c0_5 = arith.constant 0 : index
    %c0_6 = arith.constant 0 : index
    %6 = vector.load %arg2[%c1, %c0_5, %c0_6] : memref<3x10x3xbf16, #tpu.memory_space<vmem>>, vector<1x10x3xbf16>
    %7 = vector.shape_cast %6 : vector<1x10x3xbf16> to vector<10x3xbf16>
    %8 = vector.extract_strided_slice %1 {offsets = [0, 128], sizes = [3, 1792], strides = [1, 1]} : vector<3x2048xbf16> to vector<3x1792xbf16>
    %cst_7 = arith.constant dense<0.000000e+00> : vector<10x1792xf32>
    %9 = tpu.matmul %7, %8, %cst_7 {dimension_numbers = #tpu.dot_dimension_numbers<[1], [0], [0], [1], [0, 0, 1, 1], [], []>} : vector<10x3xbf16>, vector<3x1792xbf16>, vector<10x1792xf32> -> vector<10x1792xf32>
    %10 = arith.addf %5, %9 : vector<10x1792xf32>
    %c2 = arith.constant 2 : index
    %c0_8 = arith.constant 0 : index
    %c0_9 = arith.constant 0 : index
    %11 = vector.load %arg2[%c2, %c0_8, %c0_9] : memref<3x10x3xbf16, #tpu.memory_space<vmem>>, vector<1x10x3xbf16>
    %12 = vector.shape_cast %11 : vector<1x10x3xbf16> to vector<10x3xbf16>
    %13 = vector.extract_strided_slice %1 {offsets = [0, 256], sizes = [3, 1792], strides = [1, 1]} : vector<3x2048xbf16> to vector<3x1792xbf16>
    %cst_10 = arith.constant dense<0.000000e+00> : vector<10x1792xf32>
    %14 = tpu.matmul %12, %13, %cst_10 {dimension_numbers = #tpu.dot_dimension_numbers<[1], [0], [0], [1], [0, 0, 1, 1], [], []>} : vector<10x3xbf16>, vector<3x1792xbf16>, vector<10x1792xf32> -> vector<10x1792xf32>
    %15 = arith.addf %10, %14 : vector<10x1792xf32>
    %c0_11 = arith.constant 0 : index
    %c0_12 = arith.constant 0 : index
    %16 = vector.load %arg3[%c0_11, %c0_12] : memref<10x1xf32, #tpu.memory_space<vmem>>, vector<10x1xf32>
    %17 = vector.broadcast %16 : vector<10x1xf32> to vector<10x1792xf32>
    %18 = arith.addf %15, %17 : vector<10x1792xf32>
    %19 = arith.truncf %18 : vector<10x1792xf32> to vector<10x1792xbf16>
    %20 = math.tanh %19 : vector<10x1792xbf16>
    %21 = vector.extract_strided_slice %20 {offsets = [0, 0], sizes = [10, 1536], strides = [1, 1]} : vector<10x1792xbf16> to vector<10x1536xbf16>
    %22 = vector.extract_strided_slice %20 {offsets = [0, 128], sizes = [10, 1536], strides = [1, 1]} : vector<10x1792xbf16> to vector<10x1536xbf16>
    %23 = arith.maximumf %21, %22 : vector<10x1536xbf16>
    %24 = vector.extract_strided_slice %20 {offsets = [0, 256], sizes = [10, 1536], strides = [1, 1]} : vector<10x1792xbf16> to vector<10x1536xbf16>
    %25 = arith.maximumf %23, %24 : vector<10x1536xbf16>
    %c0_13 = arith.constant 0 : index
    %c0_14 = arith.constant 0 : index
    %c0_15 = arith.constant 0 : index
    %26 = vector.load %arg4[%c0_13, %c0_14, %c0_15] : memref<3x20x10xbf16, #tpu.memory_space<vmem>>, vector<1x20x10xbf16>
    %27 = vector.shape_cast %26 : vector<1x20x10xbf16> to vector<20x10xbf16>
    %28 = vector.extract_strided_slice %25 {offsets = [0, 0], sizes = [10, 1280], strides = [1, 1]} : vector<10x1536xbf16> to vector<10x1280xbf16>
    %cst_16 = arith.constant dense<0.000000e+00> : vector<20x1280xf32>
    %29 = tpu.matmul %27, %28, %cst_16 {dimension_numbers = #tpu.dot_dimension_numbers<[1], [0], [0], [1], [0, 0, 1, 1], [], []>} : vector<20x10xbf16>, vector<10x1280xbf16>, vector<20x1280xf32> -> vector<20x1280xf32>
    %c1_17 = arith.constant 1 : index
    %c0_18 = arith.constant 0 : index
    %c0_19 = arith.constant 0 : index
    %30 = vector.load %arg4[%c1_17, %c0_18, %c0_19] : memref<3x20x10xbf16, #tpu.memory_space<vmem>>, vector<1x20x10xbf16>
    %31 = vector.shape_cast %30 : vector<1x20x10xbf16> to vector<20x10xbf16>
    %32 = vector.extract_strided_slice %25 {offsets = [0, 128], sizes = [10, 1280], strides = [1, 1]} : vector<10x1536xbf16> to vector<10x1280xbf16>
    %cst_20 = arith.constant dense<0.000000e+00> : vector<20x1280xf32>
    %33 = tpu.matmul %31, %32, %cst_20 {dimension_numbers = #tpu.dot_dimension_numbers<[1], [0], [0], [1], [0, 0, 1, 1], [], []>} : vector<20x10xbf16>, vector<10x1280xbf16>, vector<20x1280xf32> -> vector<20x1280xf32>
    %34 = arith.addf %29, %33 : vector<20x1280xf32>
    %c2_21 = arith.constant 2 : index
    %c0_22 = arith.constant 0 : index
    %c0_23 = arith.constant 0 : index
    %35 = vector.load %arg4[%c2_21, %c0_22, %c0_23] : memref<3x20x10xbf16, #tpu.memory_space<vmem>>, vector<1x20x10xbf16>
    %36 = vector.shape_cast %35 : vector<1x20x10xbf16> to vector<20x10xbf16>
    %37 = vector.extract_strided_slice %25 {offsets = [0, 256], sizes = [10, 1280], strides = [1, 1]} : vector<10x1536xbf16> to vector<10x1280xbf16>
    %cst_24 = arith.constant dense<0.000000e+00> : vector<20x1280xf32>
    %38 = tpu.matmul %36, %37, %cst_24 {dimension_numbers = #tpu.dot_dimension_numbers<[1], [0], [0], [1], [0, 0, 1, 1], [], []>} : vector<20x10xbf16>, vector<10x1280xbf16>, vector<20x1280xf32> -> vector<20x1280xf32>
    %39 = arith.addf %34, %38 : vector<20x1280xf32>
    %c0_25 = arith.constant 0 : index
    %c0_26 = arith.constant 0 : index
    %40 = vector.load %arg5[%c0_25, %c0_26] : memref<20x1xf32, #tpu.memory_space<vmem>>, vector<20x1xf32>
    %41 = vector.broadcast %40 : vector<20x1xf32> to vector<20x1280xf32>
    %42 = arith.addf %39, %41 : vector<20x1280xf32>
    %43 = arith.truncf %42 : vector<20x1280xf32> to vector<20x1280xbf16>
    %44 = math.tanh %43 : vector<20x1280xbf16>
    %45 = vector.extract_strided_slice %44 {offsets = [0, 0], sizes = [20, 1024], strides = [1, 1]} : vector<20x1280xbf16> to vector<20x1024xbf16>
    %46 = vector.extract_strided_slice %44 {offsets = [0, 128], sizes = [20, 1024], strides = [1, 1]} : vector<20x1280xbf16> to vector<20x1024xbf16>
    %47 = arith.maximumf %45, %46 : vector<20x1024xbf16>
    %48 = vector.extract_strided_slice %44 {offsets = [0, 256], sizes = [20, 1024], strides = [1, 1]} : vector<20x1280xbf16> to vector<20x1024xbf16>
    %49 = arith.maximumf %47, %48 : vector<20x1024xbf16>
    %c0_27 = arith.constant 0 : index
    %c0_28 = arith.constant 0 : index
    %50 = vector.load %arg6[%c0_27, %c0_28] : memref<40x20xbf16, #tpu.memory_space<vmem>>, vector<40x20xbf16>
    %cst_29 = arith.constant dense<0.000000e+00> : vector<40x1024xf32>
    %51 = tpu.matmul %50, %49, %cst_29 {dimension_numbers = #tpu.dot_dimension_numbers<[1], [0], [0], [1], [0, 0, 1, 1], [], []>} : vector<40x20xbf16>, vector<20x1024xbf16>, vector<40x1024xf32> -> vector<40x1024xf32>
    %c0_30 = arith.constant 0 : index
    %c0_31 = arith.constant 0 : index
    %52 = vector.load %arg7[%c0_30, %c0_31] : memref<40x1xf32, #tpu.memory_space<vmem>>, vector<40x1xf32>
    %53 = vector.broadcast %52 : vector<40x1xf32> to vector<40x1024xf32>
    %54 = arith.addf %51, %53 : vector<40x1024xf32>
    %55 = arith.truncf %54 : vector<40x1024xf32> to vector<40x1024xbf16>
    %56 = math.tanh %55 : vector<40x1024xbf16>
    %c0_32 = arith.constant 0 : index
    %c0_33 = arith.constant 0 : index
    %57 = vector.load %arg8[%c0_32, %c0_33] : memref<25x40xbf16, #tpu.memory_space<vmem>>, vector<25x40xbf16>
    %cst_34 = arith.constant dense<0.000000e+00> : vector<25x1024xf32>
    %58 = tpu.matmul %57, %56, %cst_34 {dimension_numbers = #tpu.dot_dimension_numbers<[1], [0], [0], [1], [0, 0, 1, 1], [], []>} : vector<25x40xbf16>, vector<40x1024xbf16>, vector<25x1024xf32> -> vector<25x1024xf32>
    %c0_35 = arith.constant 0 : index
    %c0_36 = arith.constant 0 : index
    %59 = vector.load %arg9[%c0_35, %c0_36] : memref<25x1xf32, #tpu.memory_space<vmem>>, vector<25x1xf32>
    %60 = vector.broadcast %59 : vector<25x1xf32> to vector<25x1024xf32>
    %61 = arith.addf %58, %60 : vector<25x1024xf32>
    %cst_37 = arith.constant 0.000000e+00 : f32
    %62 = vector.broadcast %cst_37 : f32 to vector<25x1024xf32>
    %63 = arith.maximumf %61, %62 : vector<25x1024xf32>
    %64 = vector.extract_strided_slice %63 {offsets = [0, 0], sizes = [25, 128], strides = [1, 1]} : vector<25x1024xf32> to vector<25x128xf32>
    %65 = vector.extract_strided_slice %63 {offsets = [0, 128], sizes = [25, 128], strides = [1, 1]} : vector<25x1024xf32> to vector<25x128xf32>
    %66 = vector.extract_strided_slice %63 {offsets = [0, 256], sizes = [25, 128], strides = [1, 1]} : vector<25x1024xf32> to vector<25x128xf32>
    %67 = vector.extract_strided_slice %63 {offsets = [0, 384], sizes = [25, 128], strides = [1, 1]} : vector<25x1024xf32> to vector<25x128xf32>
    %68 = vector.extract_strided_slice %63 {offsets = [0, 512], sizes = [25, 128], strides = [1, 1]} : vector<25x1024xf32> to vector<25x128xf32>
    %69 = vector.extract_strided_slice %63 {offsets = [0, 640], sizes = [25, 128], strides = [1, 1]} : vector<25x1024xf32> to vector<25x128xf32>
    %70 = vector.extract_strided_slice %63 {offsets = [0, 768], sizes = [25, 128], strides = [1, 1]} : vector<25x1024xf32> to vector<25x128xf32>
    %71 = vector.extract_strided_slice %63 {offsets = [0, 896], sizes = [25, 128], strides = [1, 1]} : vector<25x1024xf32> to vector<25x128xf32>
    %72 = arith.addf %64, %65 : vector<25x128xf32>
    %73 = arith.addf %66, %67 : vector<25x128xf32>
    %74 = arith.addf %68, %69 : vector<25x128xf32>
    %75 = arith.addf %70, %71 : vector<25x128xf32>
    %76 = arith.addf %72, %73 : vector<25x128xf32>
    %77 = arith.addf %74, %75 : vector<25x128xf32>
    %78 = arith.addf %76, %77 : vector<25x128xf32>
    %c0_38 = arith.constant 0 : index
    %c0_39 = arith.constant 0 : index
    %c0_40 = arith.constant 0 : index
    %79 = vector.load %arg10[%c0_38, %c0_39, %c0_40] : memref<1x25x128xf32, #tpu.memory_space<vmem>>, vector<1x25x128xf32>
    %80 = vector.shape_cast %79 : vector<1x25x128xf32> to vector<25x128xf32>
    %81 = vector.shape_cast %78 : vector<25x128xf32> to vector<1x25x128xf32>
    tpu.vector_store %arg10[%c0_38, %c0_39, %c0_40], %81 {strides = array<i32>} : memref<1x25x128xf32, #tpu.memory_space<vmem>>, vector<1x25x128xf32>,
    return
  }
  func.func @transform_0(%arg0: i32) -> (i32, i32, i32) {
    %c0_i32 = arith.constant 0 : i32
    %c0_i32_0 = arith.constant 0 : i32
    %c0_i32_1 = arith.constant 0 : i32
    return %arg0, %c0_i32, %c0_i32_0 : i32, i32, i32
  }
  func.func @transform_1(%arg0: i32) -> (i32, i32, i32) {
    %c0_i32 = arith.constant 0 : i32
    %c0_i32_0 = arith.constant 0 : i32
    %c0_i32_1 = arith.constant 0 : i32
    %c0_i32_2 = arith.constant 0 : i32
    return %c0_i32, %c0_i32_0, %c0_i32_1 : i32, i32, i32
  }
  func.func @transform_2(%arg0: i32) -> (i32, i32) {
    %c0_i32 = arith.constant 0 : i32
    %c0_i32_0 = arith.constant 0 : i32
    %c0_i32_1 = arith.constant 0 : i32
    return %c0_i32, %c0_i32_0 : i32, i32
  }
  func.func @transform_3(%arg0: i32) -> (i32, i32, i32) {
    %c0_i32 = arith.constant 0 : i32
    %c0_i32_0 = arith.constant 0 : i32
    %c0_i32_1 = arith.constant 0 : i32
    %c0_i32_2 = arith.constant 0 : i32
    return %c0_i32, %c0_i32_0, %c0_i32_1 : i32, i32, i32
  }
  func.func @transform_4(%arg0: i32) -> (i32, i32) {
    %c0_i32 = arith.constant 0 : i32
    %c0_i32_0 = arith.constant 0 : i32
    %c0_i32_1 = arith.constant 0 : i32
    return %c0_i32, %c0_i32_0 : i32, i32
  }
  func.func @transform_5(%arg0: i32) -> (i32, i32) {
    %c0_i32 = arith.constant 0 : i32
    %c0_i32_0 = arith.constant 0 : i32
    %c0_i32_1 = arith.constant 0 : i32
    return %c0_i32, %c0_i32_0 : i32, i32
  }
  func.func @transform_6(%arg0: i32) -> (i32, i32) {
    %c0_i32 = arith.constant 0 : i32
    %c0_i32_0 = arith.constant 0 : i32
    %c0_i32_1 = arith.constant 0 : i32
    return %c0_i32, %c0_i32_0 : i32, i32
  }
  func.func @transform_7(%arg0: i32) -> (i32, i32) {
    %c0_i32 = arith.constant 0 : i32
    %c0_i32_0 = arith.constant 0 : i32
    %c0_i32_1 = arith.constant 0 : i32
    return %c0_i32, %c0_i32_0 : i32, i32
  }
  func.func @transform_8(%arg0: i32) -> (i32, i32) {
    %c0_i32 = arith.constant 0 : i32
    %c0_i32_0 = arith.constant 0 : i32
    %c0_i32_1 = arith.constant 0 : i32
    return %c0_i32, %c0_i32_0 : i32, i32
  }
  func.func @transform_9(%arg0: i32) -> (i32, i32, i32) {
    %c0_i32 = arith.constant 0 : i32
    %c0_i32_0 = arith.constant 0 : i32
    %c0_i32_1 = arith.constant 0 : i32
    return %arg0, %c0_i32, %c0_i32_0 : i32, i32, i32
  }
}

</mosaic_0001>

<bundles_post_ra>
// kernel: tpu_custom_call.1
= control target key start
LH: loop header
LB: loop body
LE: loop exit
PB: predicated region body
PF: predicated region fallthrough
CT: control target
= control target key end

     0   :  { %v55_v0 = vlaneseq  ;;  %vm122_vm0 = vcmask 1040384   ;;  %v3204_v2 = vmov 1983009808   ;;  %vm123_vm1 = vcmask 1041408   ;;  %s4148_s0 = inlined_call_operand.vmem [shape: bf16[1,3,2048], index: 0, kind: input, shape index: {}]   ;;  %s4149_s1 = inlined_call_operand.vmem [shape: bf16[3,10,3], index: 1, kind: input, shape index: {}]   ;;  %s4150_s2 = inlined_call_operand.vmem [shape: f32[10,1], index: 2, kind: input, shape index: {}]   ;;  %s4151_s4 = inlined_call_operand.vmem [shape: f32[20,1], index: 4, kind: input, shape index: {}]   ;;  %s4152_s6 = inlined_call_operand.vmem [shape: f32[40,1], index: 6, kind: input, shape index: {}]   ;;  %s4153_s8 = inlined_call_operand.vmem [shape: f32[25,1], index: 8, kind: input, shape index: {}]   ;;  %s4154_s3 = inlined_call_operand.vmem [shape: bf16[3,20,10], index: 3, kind: input, shape index: {}]   ;;  %s4155_s5 = inlined_call_operand.vmem [shape: bf16[40,20], index: 5, kind: input, shape index: {}]   ;;  %s4156_s7 = inlined_call_operand.vmem [shape: bf16[25,40], index: 7, kind: input, shape index: {}]   ;;  %s4157_s9 = inlined_call_operand.vmem [shape: f32[1,25,128], index: 9, kind: output, shape index: {}]  }
   0x1   :  { %v33_v1 = vld [vmem:[%s4148_s0] sm:$0xff]  ;;  %v53_v3 = vunpack.c.l.s4 %v3204_v2  ;;  %v34_v5 = vld [vmem:[%s4148_s0 + $0x8] sm:$0xff]  ;;  %v4158_v6 = vmov 0   ;;  %v3206_v9 = vmov 65535   ;;  %v35_v13 = vld [vmem:[%s4148_s0 + $0x10] sm:$0xff]  ;;  %vm118_vm2 = vcmask 23552  }
   0x2   :  { %v56_v4 = vshrl.u32 %v55_v0, 7  ;;  %200 = vmatprep.mubr.bf16.mxu0 %v4158_v6  ;;  %243 = vmatprep.mubr.bf16.mxu1 %v4158_v6  ;;  %v51_v7 = vcombine.high %v33_v1, %v33_v1  ;;  %v124_v10 = vsel %vm122_vm0, 4294967295, %v3206_v9  ;;  %v68_v11 = vcombine.high %v34_v5, %v34_v5  ;;  %v1125_v14 = vld [vmem:[%s4150_s2] sm:$0xff]  ;;  %v1126_v21 = vld [vmem:[%s4150_s2 + $0x8] sm:$0x3]  ;;  %v36_v27 = vld [vmem:[%s4148_s0 + $0x18] sm:$0xff] }
   0x3   :  { %v54_v8 = vunpack.c.0.s8 %v53_v3  ;;  %3068 = vset.pattern.permute.xlu0 %v4158_v6  ;;  %3069 = vset.pattern.permute.xlu1 %v4158_v6  ;;  %v3274_v15 = vsel %vm123_vm1, %v124_v10, 0  ;;  %v85_v16 = vcombine.high %v35_v13, %v35_v13  ;;  %v3071_v35 = vld [vmem:[%s4149_s1 + $0x8] sm:$0x1f]   ;;  %v102_v41 = vcombine.high %v36_v27, %v36_v27  ;;  %v2230_v44 = vld [vmem:[%s4152_s6 + $0x10] sm:$0xff]  ;;  %v2228_v48 = vld [vmem:[%s4152_s6] sm:$0xff] }
   0x4   :  { %1129 = vperm.xlu0 %3068, %v1125_v14   ;;  %v2104_v37 = vld [vmem:[%s4151_s4 + $0x8] sm:$0xff]  ;;  %v2601_v52 = vld [vmem:[%s4153_s8] sm:$0xff]  ;;  %v2603_v54 = vld [vmem:[%s4153_s8 + $0x10] sm:$0xff]  ;;  %vm1239_vm3 = vcmask 1044480   ;;  %vm1232_vm4 = vcmask 80896   ;;  %vm2271_vm5 = vcmask 162816  }
   0x5   :  { %v57_v12 = vsub.s32 %v54_v8, %v56_v4  ;;  %v3075_v56 = vld [vmem:[%s4149_s1] sm:$0x1f]   ;;  %v3076_v57 = vld [vmem:[%s4149_s1 + $0x10] sm:$0x1f]   ;;  %vm2642_vm6 = vcmask 1043456   ;;  %vm2635_vm7 = vcmask 326656  }
   0x7   :  { %v65_v17 = vrot.slane %v51_v7, %v57_v12  ;;  %v75_v18 = vrot.slane %v34_v5, %v57_v12  ;;  %v3276_v19 = vrot.slane %v33_v1, %v57_v12  ;;  %v82_v20 = vrot.slane %v68_v11, %v57_v12 }
   0x8   :  { %v92_v22 = vrot.slane %v35_v13, %v57_v12  ;;  %1134 = vperm.xlu0 %3068, %v1126_v21   ;;  %v99_v33 = vrot.slane %v85_v16, %v57_v12  ;;  %v109_v36 = vrot.slane %v36_v27, %v57_v12  ;;  %v3335_v46 = vrot.slane %v102_v41, %v57_v12 }
   0x9   :  { %v3282_v23 = vand.u32 %v3274_v15, %v65_v17  ;;  %v83_v24 = vcombine.high %v75_v18, %v75_v18  ;;  %v3285_v25 = vand.u32 %v3274_v15, %v75_v18  ;;  %v66_v26 = vcombine.high %v3276_v19, %v3276_v19 }
   0xa   :  { %v67_v28 = vcombine.high %v65_v17, %v65_v17  ;;  %v84_v29 = vcombine.high %v82_v20, %v82_v20  ;;  %v3293_v30 = vand.u32 %v3274_v15, %v82_v20  ;;  %v3299_v32 = vand.u32 %v3274_v15, %v92_v22 }
   0xb   :  { %182 = vmatprep.subr.bf16.mxu0 %v3282_v23  ;;  %225 = vmatprep.subr.bf16.mxu1 %v3285_v25  ;;  %v127_v31 = vand.u32 %v3274_v15, %v66_v26  ;;  %v3311_v38 = vand.u32 %v3274_v15, %v83_v24  ;;  %v3320_v40 = vand.u32 %v3274_v15, %v99_v33 }
   0xc   :  { %v3302_v34 = vand.u32 %v3274_v15, %v67_v28  ;;  %v3316_v39 = vand.u32 %v3274_v15, %v84_v29  ;;  %2113 = vperm.xlu0 %3068, %v2104_v37   ;;  %v3324_v42 = vand.u32 %v3274_v15, %v109_v36  ;;  %v100_v43 = vcombine.high %v92_v22, %v92_v22 }
   0xd   :  { %183 = vmatpush1.bf16.msra.mxu0 %v127_v31  ;;  %v101_v45 = vcombine.high %v99_v33, %v99_v33  ;;  %v3347_v50 = vand.u32 %v3274_v15, %v3335_v46  ;;  %v117_v51 = vcombine.high %v109_v36, %v109_v36  ;;  %v478_v55 = vand.u32 %v3274_v15, %v3276_v19 }
   0xe   :  { %226 = vmatpush1.bf16.msra.mxu1 %v3302_v34  ;;  %268 = vmatprep.subr.bf16.mxu0 %v3293_v30  ;;  %v151_v47 = vand.u32 %v3274_v15, %v100_v43  ;;  %v789_v58 = vcombine.high %v3335_v46, %v3335_v46 }
   0xf   :  { %311 = vmatprep.subr.bf16.mxu1 %v3299_v32  ;;  %v3343_v49 = vand.u32 %v3274_v15, %v101_v45  ;;  %v163_v53 = vand.u32 %v3274_v15, %v117_v51 }
  0x10   :  { %2950 = vmatmul.mubr.msk.bf16.vlgmr.msra.gmra.mxu0 %vm118_vm2, %v3071_v35  ;;  %2245 = vperm.xlu0 %3068, %v2230_v44   ;;  %v794_v59 = vand.u32 %v789_v58, %v3274_v15 }
  0x11   :  { %2951 = vmatmul.mubr.msk.bf16.vlgmr.msra.gmra.mxu1 %vm118_vm2, %v3071_v35  ;;  %269 = vmatpush1.bf16.msra.mxu0 %v3311_v38 }
  0x12   :  { %312 = vmatpush1.bf16.msra.mxu1 %v3316_v39  ;;  %286 = vmatprep.mubr.bf16.mxu0 %v4158_v6 }
  0x13   :  { %329 = vmatprep.mubr.bf16.mxu1 %v4158_v6  ;;  %354 = vmatprep.subr.bf16.mxu0 %v3320_v40 }
  0x14   :  { %397 = vmatprep.subr.bf16.mxu1 %v3324_v42  ;;  %2235 = vperm.xlu0 %3068, %v2228_v48  }
  0x18   :  { %2952 = vmatmul.mubr.msk.bf16.vlgmr.msra.gmra.mxu0 %vm118_vm2, %v3071_v35  ;;  %2607 = vperm.xlu0 %3068, %v2601_v52  }
  0x19   :  { %2953 = vmatmul.mubr.msk.bf16.vlgmr.msra.gmra.mxu1 %vm118_vm2, %v3071_v35  ;;  %355 = vmatpush1.bf16.msra.mxu0 %v151_v47 }
  0x1a   :  { %398 = vmatpush1.bf16.msra.mxu1 %v3343_v49  ;;  %372 = vmatprep.mubr.bf16.mxu0 %v4158_v6 }
  0x1b   :  { %415 = vmatprep.mubr.bf16.mxu1 %v4158_v6  ;;  %440 = vmatprep.subr.bf16.mxu0 %v3347_v50 }
  0x1c   :  { %494 = vmatprep.subr.bf16.mxu1 %v127_v31  ;;  %2617 = vperm.xlu0 %3068, %v2603_v54  }
  0x20   :  { %2954 = vmatmul.mubr.msk.bf16.vlgmr.msra.gmra.mxu0 %vm118_vm2, %v3071_v35 }
  0x21   :  { %2955 = vmatmul.mubr.msk.bf16.vlgmr.msra.gmra.mxu1 %vm118_vm2, %v3071_v35  ;;  %441 = vmatpush1.bf16.msra.mxu0 %v163_v53 }
  0x22   :  { %495 = vmatpush1.bf16.msra.mxu1 %v478_v55  ;;  %458 = vmatprep.mubr.bf16.mxu0 %v4158_v6 }
  0x23   :  { %512 = vmatprep.mubr.bf16.mxu1 %v4158_v6  ;;  %537 = vmatprep.subr.bf16.mxu0 %v3302_v34 }
  0x24   :  { %580 = vmatprep.subr.bf16.mxu1 %v3311_v38 }
  0x28   :  { %2956 = vmatmul.mubr.msk.bf16.vlgmr.msra.gmra.mxu0 %vm118_vm2, %v3071_v35 }
  0x29   :  { %2958 = vmatmul.mubr.msk.bf16.vlgmr.msra.gmra.mxu1 %vm118_vm2, %v3075_v56  ;;  %538 = vmatpush1.bf16.msra.mxu0 %v3282_v23 }
  0x2a   :  { %581 = vmatpush1.bf16.msra.mxu1 %v3285_v25  ;;  %555 = vmatprep.mubr.bf16.mxu0 %v4158_v6 }
  0x2b   :  { %598 = vmatprep.mubr.bf16.mxu1 %v4158_v6  ;;  %623 = vmatprep.subr.bf16.mxu0 %v3316_v39 }
  0x2c   :  { %666 = vmatprep.subr.bf16.mxu1 %v151_v47 }
  0x30   :  { %2959 = vmatmul.mubr.msk.bf16.vlgmr.msra.gmra.mxu0 %vm118_vm2, %v3075_v56 }
  0x31   :  { %2960 = vmatmul.mubr.msk.bf16.vlgmr.msra.gmra.mxu1 %vm118_vm2, %v3075_v56  ;;  %624 = vmatpush1.bf16.msra.mxu0 %v3293_v30 }
  0x32   :  { %667 = vmatpush1.bf16.msra.mxu1 %v3299_v32  ;;  %641 = vmatprep.mubr.bf16.mxu0 %v4158_v6 }
  0x33   :  { %684 = vmatprep.mubr.bf16.mxu1 %v4158_v6  ;;  %709 = vmatprep.subr.bf16.mxu0 %v3343_v49 }
  0x34   :  { %752 = vmatprep.subr.bf16.mxu1 %v163_v53 }
  0x38   :  { %2961 = vmatmul.mubr.msk.bf16.vlgmr.msra.gmra.mxu0 %vm118_vm2, %v3075_v56 }
  0x39   :  { %2962 = vmatmul.mubr.msk.bf16.vlgmr.msra.gmra.mxu1 %vm118_vm2, %v3075_v56  ;;  %710 = vmatpush1.bf16.msra.mxu0 %v3320_v40 }
  0x3a   :  { %753 = vmatpush1.bf16.msra.mxu1 %v3324_v42  ;;  %727 = vmatprep.mubr.bf16.mxu0 %v4158_v6 }
  0x3b   :  { %770 = vmatprep.mubr.bf16.mxu1 %v4158_v6  ;;  %810 = vmatprep.subr.bf16.mxu0 %v3302_v34 }
  0x3c   :  { %853 = vmatprep.subr.bf16.mxu1 %v3311_v38 }
  0x40   :  { %2963 = vmatmul.mubr.msk.bf16.vlgmr.msra.gmra.mxu0 %vm118_vm2, %v3075_v56 }
  0x41   :  { %2964 = vmatmul.mubr.msk.bf16.vlgmr.msra.gmra.mxu1 %vm118_vm2, %v3075_v56  ;;  %811 = vmatpush1.bf16.msra.mxu0 %v3282_v23 }
  0x42   :  { %854 = vmatpush1.bf16.msra.mxu1 %v3285_v25  ;;  %828 = vmatprep.mubr.bf16.mxu0 %v4158_v6 }
  0x43   :  { %871 = vmatprep.mubr.bf16.mxu1 %v4158_v6  ;;  %896 = vmatprep.subr.bf16.mxu0 %v3316_v39 }
  0x44   :  { %939 = vmatprep.subr.bf16.mxu1 %v151_v47 }
  0x48   :  { %2968 = vmatmul.mubr.msk.bf16.vlgmr.msra.gmra.mxu0 %vm118_vm2, %v3076_v57 }
  0x49   :  { %2969 = vmatmul.mubr.msk.bf16.vlgmr.msra.gmra.mxu1 %vm118_vm2, %v3076_v57  ;;  %897 = vmatpush1.bf16.msra.mxu0 %v3293_v30 }
  0x4a   :  { %940 = vmatpush1.bf16.msra.mxu1 %v3299_v32  ;;  %914 = vmatprep.mubr.bf16.mxu0 %v4158_v6 }
  0x4b   :  { %957 = vmatprep.mubr.bf16.mxu1 %v4158_v6  ;;  %982 = vmatprep.subr.bf16.mxu0 %v3343_v49 }
  0x4c   :  { %1025 = vmatprep.subr.bf16.mxu1 %v163_v53 }
  0x50   :  { %2970 = vmatmul.mubr.msk.bf16.vlgmr.msra.gmra.mxu0 %vm118_vm2, %v3076_v57 }
  0x51   :  { %2971 = vmatmul.mubr.msk.bf16.vlgmr.msra.gmra.mxu1 %vm118_vm2, %v3076_v57  ;;  %983 = vmatpush1.bf16.msra.mxu0 %v3320_v40 }
  0x52   :  { %1026 = vmatpush1.bf16.msra.mxu1 %v3324_v42  ;;  %1000 = vmatprep.mubr.bf16.mxu0 %v4158_v6 }
  0x53   :  { %1043 = vmatprep.mubr.bf16.mxu1 %v4158_v6  ;;  %1068 = vmatprep.subr.bf16.mxu0 %v794_v59 }
  0x58   :  { %2972 = vmatmul.mubr.msk.bf16.vlgmr.msra.gmra.mxu0 %vm118_vm2, %v3076_v57 }
  0x59   :  { %2973 = vmatmul.mubr.msk.bf16.vlgmr.msra.gmra.mxu1 %vm118_vm2, %v3076_v57  ;;  %1069 = vmatpush1.bf16.msra.mxu0 %v3347_v50 }
  0x5a   :  { %1086 = vmatprep.mubr.bf16.mxu0 %v4158_v6  ;;  %1302 = vmatprep.mubr.bf16.mxu1 %v4158_v6 }
  0x60   :  { %2974 = vmatmul.mubr.msk.bf16.vlgmr.msra.gmra.mxu0 %vm118_vm2, %v3076_v57 }
  0x61   :  { %1353 = vmatprep.mubr.bf16.mxu0 %v4158_v6 }
  0x7f   :  { %v3502_v54 = vpop.permute.xlu0 %1129 }
  0xd0   :  { %v202_v60 = vpop.f32.mrf.mxu0 }
  0xd1   :  { %v245_v61 = vpop.f32.mrf.mxu1 }
  0xd2   :  { %v204_v62 = vpop.f32.mrf.mxu0 }
  0xd3   :  { %v3428_v63 = vpop.f32.mrf.mxu1 }
  0xd4   :  { %v206_v0 = vpop.f32.mrf.mxu0 }
  0xd5   :  { %v3430_v1 = vpop.f32.mrf.mxu1 }
  0xd6   :  { %v3432_v2 = vpop.f32.mrf.mxu0 }
  0xd7   :  { %v3434_v3 = vpop.f32.mrf.mxu1 }
  0xd8   :  { %v3436_v4 = vpop.f32.mrf.mxu0 }
  0xd9   :  { %v3438_v5 = vpop.f32.mrf.mxu1 }
  0xda   :  { %v3440_v7 = vpop.f32.mrf.mxu0 }
  0xdb   :  { %v3442_v8 = vpop.f32.mrf.mxu1 }
  0xdc   :  { %v3444_v9 = vpop.f32.mrf.mxu0 }
  0xdd   :  { %v3446_v10 = vpop.f32.mrf.mxu1 }
  0xde   :  { %v3448_v11 = vpop.f32.mrf.mxu0 }
  0xdf   :  { %v3450_v12 = vpop.f32.mrf.mxu1 }
  0xe0   :  { %v3452_v13 = vpop.f32.mrf.mxu0 }
  0xe1   :  { %v3454_v14 = vpop.f32.mrf.mxu1 }
  0xe2   :  { %v3456_v15 = vpop.f32.mrf.mxu0 }
  0xe3   :  { %v3458_v16 = vpop.f32.mrf.mxu1 }
  0xe4   :  { %v3460_v17 = vpop.f32.mrf.mxu0 }
  0xe5   :  { %v3462_v18 = vpop.f32.mrf.mxu1 }
  0xe6   :  { %v3464_v19 = vpop.f32.mrf.mxu0 }
  0xe7   :  { %v3466_v20 = vpop.f32.mrf.mxu1 }
  0xe8   :  { %4161 = vst [vmem:[#allocation2_spill] sm:$0xff] %v3466_v20  ;;  %v3468_v21 = vpop.f32.mrf.mxu0 }
  0xe9   :  { %4162 = vst [vmem:[#allocation3_spill] sm:$0xff] %v3468_v21  ;;  %v514_v22 = vpop.f32.mrf.mxu1 }
  0xea   :  { %v462_v23 = vpop.f32.mrf.mxu0  ;;  %v515_v56 = vadd.f32 %v514_v22, %v202_v60  ;;  %v3508_v22 = vpop.permute.xlu0 %1134 }
  0xeb   :  { %v516_v24 = vpop.f32.mrf.mxu1 }
  0xec   :  { %v3470_v25 = vpop.f32.mrf.mxu0  ;;  %v517_v6 = vadd.f32 %v516_v24, %v204_v62 }
  0xed   :  { %4163 = vst [vmem:[#allocation4_spill] sm:$0xff] %v3470_v25  ;;  %v518_v26 = vpop.f32.mrf.mxu1 }
  0xee   :  { %v3472_v27 = vpop.f32.mrf.mxu0 }
  0xef   :  { %4164 = vst [vmem:[#allocation5_spill] sm:$0xff] %v3472_v27  ;;  %v520_v28 = vpop.f32.mrf.mxu1  ;;  %v519_v27 = vadd.f32 %v518_v26, %v206_v0 }
  0xf0   :  { %v557_v29 = vpop.f32.mrf.mxu0  ;;  %v521_v21 = vadd.f32 %v520_v28, %v3432_v2 }
  0xf1   :  { %v600_v30 = vpop.f32.mrf.mxu1  ;;  %v558_v58 = vadd.f32 %v557_v29, %v245_v61 }
  0xf2   :  { %v559_v31 = vpop.f32.mrf.mxu0  ;;  %v601_v2 = vadd.f32 %v600_v30, %v3436_v4 }
  0xf3   :  { %v602_v32 = vpop.f32.mrf.mxu1 }
  0xf4   :  { %v561_v33 = vpop.f32.mrf.mxu0  ;;  %v603_v29 = vadd.f32 %v602_v32, %v3440_v7 }
  0xf5   :  { %v604_v34 = vpop.f32.mrf.mxu1 }
  0xf6   :  { %v563_v35 = vpop.f32.mrf.mxu0 }
  0xf7   :  { %v3474_v36 = vpop.f32.mrf.mxu1  ;;  %v564_v60 = vadd.f32 %v563_v35, %v3434_v3 }
  0xf8   :  { %v643_v37 = vpop.f32.mrf.mxu0 }
  0xf9   :  { %v3476_v38 = vpop.f32.mrf.mxu1 }
  0xfa   :  { %v645_v39 = vpop.f32.mrf.mxu0 }
  0xfb   :  { %v3478_v40 = vpop.f32.mrf.mxu1  ;;  %v646_v7 = vadd.f32 %v645_v39, %v3442_v8 }
  0xfc   :  { %v647_v41 = vpop.f32.mrf.mxu0 }
  0xfd   :  { %v3480_v42 = vpop.f32.mrf.mxu1 }
  0xfe   :  { %v3482_v43 = vpop.f32.mrf.mxu0 }
  0xff   :  { %v3484_v44 = vpop.f32.mrf.mxu1  ;;  %v650_v8 = vadd.f32 %v3482_v43, %v3450_v12  ;;  %v691_v12 = vadd.f32 %v3480_v42, %v3460_v17 }
 0x100   :  { %v3486_v45 = vpop.f32.mrf.mxu0 }
 0x101   :  { %v3488_v46 = vpop.f32.mrf.mxu1 }
 0x102   :  { %4165 = vst [vmem:[#allocation6_spill] sm:$0xff] %v3488_v46  ;;  %v3490_v47 = vpop.f32.mrf.mxu0 }
 0x103   :  { %v774_v48 = vpop.f32.mrf.mxu1 }
 0x104   :  { %v3492_v49 = vadd.f32 %v774_v48, %v462_v23  ;;  %v3494_v50 = vpop.f32.mrf.mxu0  ;;  %v560_v48 = vadd.f32 %v559_v31, %v3428_v63 }
 0x105   :  { %v3496_v51 = vpop.f32.mrf.mxu1 }
 0x106   :  { %4166 = vst [vmem:[#allocation7_spill] sm:$0xff] %v3492_v49  ;;  %4167 = vst [vmem:[#allocation8_spill] sm:$0xff] %v3496_v51  ;;  %v3498_v52 = vpop.f32.mrf.mxu0  ;;  %v562_v49 = vadd.f32 %v561_v33, %v3430_v1 }
 0x107   :  { %4168 = vst [vmem:[#allocation9_spill] sm:$0xff] %v3498_v52  ;;  %v3500_v53 = vpop.f32.mrf.mxu1 }
 0x108   :  { %4169 = vst [vmem:[#allocation10_spill] sm:$0xff] %v3500_v53  ;;  %v830_v55 = vpop.f32.mrf.mxu0 }
 0x109   :  { %v873_v57 = vpop.f32.mrf.mxu1  ;;  %v1097_v25 = vadd.f32 %v830_v55, %v515_v56 }
 0x10a   :  { %v832_v59 = vpop.f32.mrf.mxu0  ;;  %v1099_v51 = vadd.f32 %v873_v57, %v558_v58 }
 0x10b   :  { %v875_v23 = vpop.f32.mrf.mxu1  ;;  %v1098_v53 = vadd.f32 %v832_v59, %v517_v6  ;;  %v3511_v24 = vadd.f32 %v3502_v54, %v1097_v25 }
 0x10c   :  { %v834_v46 = vpop.f32.mrf.mxu0  ;;  %v1100_v61 = vadd.f32 %v875_v23, %v560_v48  ;;  %v1139_v6 = vadd.f32 %v3502_v54, %v1099_v51 }
 0x10d   :  { %v1111_v52 = vadd.f32 %v834_v46, %v519_v27  ;;  %v877_v20 = vpop.f32.mrf.mxu1 }
 0x10e   :  { %v1113_v62 = vadd.f32 %v877_v20, %v562_v49  ;;  %v836_v0 = vpop.f32.mrf.mxu0  ;;  %v1138_v20 = vadd.f32 %v3502_v54, %v1098_v53  ;;  %v1140_v4 = vadd.f32 %v3502_v54, %v1100_v61  ;;  %v605_v49 = vadd.f32 %v604_v34, %v3444_v9 }
 0x10f   :  { %v3514_v63 = vadd.f32 %v3508_v22, %v1111_v52  ;;  %v1112_v1 = vadd.f32 %v836_v0, %v521_v21  ;;  %v879_v26 = vpop.f32.mrf.mxu1  ;;  %v644_v21 = vadd.f32 %v643_v37, %v3438_v5  ;;  %v648_v53 = vadd.f32 %v647_v41, %v3446_v10 }
 0x110   :  { %v1153_v27 = vadd.f32 %v3508_v22, %v1113_v62  ;;  %v1114_v3 = vadd.f32 %v879_v26, %v564_v60  ;;  %v916_v28 = vpop.f32.mrf.mxu0  ;;  %v607_v5 = vadd.f32 %v3474_v36, %v3448_v11  ;;  %v687_v9 = vadd.f32 %v3476_v38, %v3452_v13 }
 0x111   :  { %v1165_v25 = vpack.c.bf16 %v3514_v63, %v3511_v24  ;;  %v1152_v31 = vadd.f32 %v3508_v22, %v1112_v1  ;;  %v959_v33 = vpop.f32.mrf.mxu1  ;;  %v1101_v51 = vadd.f32 %v916_v28, %v601_v2  ;;  %v689_v36 = vadd.f32 %v3478_v40, %v3456_v15  ;;  %v3604_v24 = vld [vmem:[%s4154_s3 + $0xc] sm:$0xff]  }
 0x112   :  { %v1167_v30 = vpack.c.bf16 %v1153_v27, %v1139_v6  ;;  %v1154_v35 = vadd.f32 %v3508_v22, %v1114_v3  ;;  %v918_v46 = vpop.f32.mrf.mxu0  ;;  %v1103_v56 = vadd.f32 %v959_v33, %v644_v21  ;;  %v730_v26 = vadd.f32 %v3486_v45, %v3454_v14 }
 0x113   :  { %v1166_v32 = vpack.c.bf16 %v1152_v31, %v1138_v20  ;;  %v961_v52 = vpop.f32.mrf.mxu1  ;;  %v1102_v37 = vadd.f32 %v918_v46, %v603_v29  ;;  %v1141_v41 = vadd.f32 %v3502_v54, %v1101_v51  ;;  %v732_v27 = vadd.f32 %v3490_v47, %v3458_v16  ;;  %v4171_v16 = vld [vmem:[#allocation9_spill] sm:$0xff] }
 0x114   :  { %3088 = vtanh.bf16 %v1167_v30  ;;  %v1168_v55 = vpack.c.bf16 %v1154_v35, %v1140_v4  ;;  %v920_v57 = vpop.f32.mrf.mxu0  ;;  %v1104_v34 = vadd.f32 %v961_v52, %v646_v7  ;;  %v1143_v60 = vadd.f32 %v3502_v54, %v1103_v56  ;;  %v4170_v4 = vld [vmem:[#allocation2_spill] sm:$0xff]  ;;  %v4172_v52 = vld [vmem:[#allocation3_spill] sm:$0xff] }
 0x115   :  { %3090 = vtanh.bf16 %v1166_v32  ;;  %v1115_v58 = vadd.f32 %v920_v57, %v605_v49  ;;  %v963_v59 = vpop.f32.mrf.mxu1  ;;  %v1142_v43 = vadd.f32 %v3502_v54, %v1102_v37  ;;  %v734_v28 = vadd.f32 %v3494_v50, %v3462_v18 }
 0x116   :  { %v1117_v39 = vadd.f32 %v963_v59, %v648_v53  ;;  %v922_v10 = vpop.f32.mrf.mxu0  ;;  %3092 = vtanh.bf16 %v1168_v55  ;;  %v1144_v15 = vadd.f32 %v3502_v54, %v1104_v34  ;;  %v693_v45 = vadd.f32 %v3484_v44, %v3464_v19  ;;  %v4173_v53 = vld [vmem:[#allocation6_spill] sm:$0xff]  ;;  %v4175_v59 = vld [vmem:[#allocation8_spill] sm:$0xff] }
 0x117   :  { %v1155_v23 = vadd.f32 %v3508_v22, %v1115_v58  ;;  %v1116_v48 = vadd.f32 %v922_v10, %v607_v5  ;;  %v965_v11 = vpop.f32.mrf.mxu1  ;;  %v736_v47 = vadd.f32 %v4171_v16, %v4170_v4  ;;  %v773_v55 = vadd.f32 %v4173_v53, %v4172_v52  ;;  %v4174_v58 = vld [vmem:[#allocation4_spill] sm:$0xff]  ;;  %v2232_v16 = vld [vmem:[%s4152_s6 + $0x20] sm:$0xff] }
 0x118   :  { %v1157_v13 = vadd.f32 %v3508_v22, %v1117_v39  ;;  %v1118_v38 = vadd.f32 %v965_v11, %v650_v8  ;;  %v1002_v61 = vpop.f32.mrf.mxu0  ;;  %v4176_v11 = vld [vmem:[#allocation7_spill] sm:$0xff] }
 0x119   :  { %v1169_v62 = vpack.c.bf16 %v1155_v23, %v1141_v41  ;;  %v1156_v0 = vadd.f32 %v3508_v22, %v1116_v48  ;;  %v1045_v1 = vpop.f32.mrf.mxu1  ;;  %v1105_v42 = vadd.f32 %v1002_v61, %v687_v9  ;;  %v777_v9 = vadd.f32 %v4175_v59, %v4174_v58 }
 0x11a   :  { %v1171_v40 = vpack.c.bf16 %v1157_v13, %v1143_v60  ;;  %v1158_v2 = vadd.f32 %v3508_v22, %v1118_v38  ;;  %v1004_v6 = vpop.f32.mrf.mxu0  ;;  %v1107_v20 = vadd.f32 %v1045_v1, %v730_v26 }
 0x11b   :  { %3094 = vtanh.bf16 %v1169_v62  ;;  %v1170_v17 = vpack.c.bf16 %v1156_v0, %v1142_v43  ;;  %v1047_v3 = vpop.f32.mrf.mxu1  ;;  %v1106_v31 = vadd.f32 %v1004_v6, %v689_v36  ;;  %v1145_v18 = vadd.f32 %v3502_v54, %v1105_v42  ;;  %v4178_v43 = vld [vmem:[#allocation10_spill] sm:$0xff] }
 0x11c   :  { %3096 = vtanh.bf16 %v1171_v40  ;;  %v1172_v29 = vpack.c.bf16 %v1158_v2, %v1144_v15  ;;  %v1006_v14 = vpop.f32.mrf.mxu0  ;;  %v1108_v30 = vadd.f32 %v1047_v3, %v732_v27  ;;  %v1147_v32 = vadd.f32 %v3502_v54, %v1107_v20  ;;  %v2105_v27 = vld [vmem:[%s4151_s4 + $0x10] sm:$0xf] }
 0x11d   :  { %3098 = vtanh.bf16 %v1170_v17  ;;  %v1119_v33 = vadd.f32 %v1006_v14, %v691_v12  ;;  %v1049_v21 = vpop.f32.mrf.mxu1  ;;  %v1146_v56 = vadd.f32 %v3502_v54, %v1106_v31  ;;  %v4177_v12 = vld [vmem:[#allocation5_spill] sm:$0xff]  ;;  %2118 = vperm.xlu1 %3069, %v2105_v27  }
 0x11e   :  { %v1121_v35 = vadd.f32 %v1049_v21, %v734_v28  ;;  %v1008_v46 = vpop.f32.mrf.mxu0  ;;  %3100 = vtanh.bf16 %v1172_v29  ;;  %v1148_v8 = vadd.f32 %v3502_v54, %v1108_v30  ;;  %v779_v62 = vadd.f32 %v4178_v43, %v4177_v12  ;;  %v3080_v43 = vld [vmem:[%s4154_s3 + $0x8] ss:$0 sps:$4 sm:$0x33]  }
 0x11f   :  { %v1159_v50 = vadd.f32 %v3508_v22, %v1119_v33  ;;  %v1120_v49 = vadd.f32 %v1008_v46, %v693_v45  ;;  %v1051_v7 = vpop.f32.mrf.mxu1  ;;  %v2103_v45 = vld [vmem:[%s4151_s4] sm:$0xff] }
 0x120   :  { %v1161_v19 = vadd.f32 %v3508_v22, %v1121_v35  ;;  %v1122_v44 = vadd.f32 %v1051_v7, %v736_v47  ;;  %v1088_v51 = vpop.f32.mrf.mxu0 }
 0x121   :  { %v1173_v57 = vpack.c.bf16 %v1159_v50, %v1145_v18  ;;  %v1160_v5 = vadd.f32 %v3508_v22, %v1120_v49  ;;  %v1109_v48 = vadd.f32 %v1088_v51, %v773_v55  ;;  %2108 = vperm.xlu1 %3069, %v2103_v45   ;;  %v4179_v18 = vmov 0   ;;  %v3078_v51 = vld [vmem:[%s4154_s3 + $0x14] ss:$0 sps:$4 sm:$0x33]  }
 0x122   :  { %v3566_v37 = vpop.eup %3088  ;;  %v1175_v34 = vpack.c.bf16 %v1161_v19, %v1147_v32  ;;  %v1162_v39 = vadd.f32 %v3508_v22, %v1122_v44  ;;  %v1090_v10 = vpop.f32.mrf.mxu0  ;;  %v2231_v32 = vld [vmem:[%s4152_s6 + $0x18] sm:$0xff] }
 0x123   :  { %v3572_v41 = vpop.eup %3090  ;;  %3102 = vtanh.bf16 %v1173_v57  ;;  %v1174_v23 = vpack.c.bf16 %v1160_v5, %v1146_v56  ;;  %v1110_v36 = vadd.f32 %v1090_v10, %v4176_v11  ;;  %v1149_v26 = vadd.f32 %v3502_v54, %v1109_v48  ;;  %v2229_v57 = vld [vmem:[%s4152_s6 + $0x8] sm:$0xff] }
 0x124   :  { %v1176_v60 = vpack.c.bf16 %v1162_v39, %v1148_v8  ;;  %v1092_v13 = vpop.f32.mrf.mxu0  ;;  %v1194_v38 = vmax.bf16 %v3572_v41, %v3566_v37  ;;  %v3093_v61 = vpop.eup %3092 }
 0x125   :  { %3104 = vtanh.bf16 %v1174_v23  ;;  %v1123_v0 = vadd.f32 %v1092_v13, %v777_v9  ;;  %v1195_v2 = vmax.bf16 %v3093_v61, %v3566_v37  ;;  %v1150_v42 = vadd.f32 %v3502_v54, %v1110_v36  ;;  %2255 = vperm.xlu1 %3069, %v2232_v16   ;;  %v2602_v23 = vld [vmem:[%s4153_s8 + $0x8] sm:$0xff] }
 0x126   :  { %3106 = vtanh.bf16 %v1175_v34  ;;  %v1094_v1 = vpop.f32.mrf.mxu0  ;;  %v3582_v6 = vmax.bf16 %v3093_v61, %v1194_v38 }
 0x127   :  { %3108 = vtanh.bf16 %v1176_v60  ;;  %v1163_v15 = vadd.f32 %v3508_v22, %v1123_v0  ;;  %v1124_v40 = vadd.f32 %v1094_v1, %v779_v62  ;;  %v2604_v60 = vld [vmem:[%s4153_s8 + $0x18] sm:$0x1] }
 0x128   :  { %3110 = vtanh.bf16 %v1165_v25  ;;  %v3081_v1 = vld [vmem:[%s4154_s3 + $0x18] sm:$0xff]  }
 0x129   :  { %v3095_v17 = vpop.eup %3094  ;;  %v1177_v3 = vpack.c.bf16 %v1163_v15, %v1149_v26  ;;  %v1164_v28 = vadd.f32 %v3508_v22, %v1124_v40  ;;  %v1241_v22 = vsel %vm1239_vm3, %v3582_v6, 0  ;;  %2250 = vperm.xlu1 %3069, %v2231_v32   ;;  %v3082_v26 = vld [vmem:[%s4154_s3 + $0x20] ss:$0 sps:$4 sm:$0x33]  }
 0x12a   :  { %v3097_v29 = vpop.eup %3096  ;;  %v3592_v20 = vmax.bf16 %v3095_v17, %v1195_v2  ;;  %v1196_v14 = vmax.bf16 %v3095_v17, %v3093_v61  ;;  %v3079_v61 = vld [vmem:[%s4154_s3] sm:$0xff]  }
 0x12b   :  { %v3099_v31 = vpop.eup %3098  ;;  %3112 = vtanh.bf16 %v1177_v3  ;;  %v1178_v54 = vpack.c.bf16 %v1164_v28, %v1150_v42 }
 0x12c   :  { %2980 = vmatprep.subr.msk.bf16.mxu1 %vm1239_vm3, %v3592_v20  ;;  %v1197_v63 = vmax.bf16 %v3099_v31, %v3095_v17  ;;  %v3606_v25 = vmax.bf16 %v3099_v31, %v1196_v14  ;;  %v1198_v33 = vmax.bf16 %v3099_v31, %v3097_v29  ;;  %v3101_v21 = vpop.eup %3100 }
 0x12d   :  { %3114 = vtanh.bf16 %v1178_v54  ;;  %1285 = vmatpush1.bf16.msra.mxu1 %v1241_v22  ;;  %v1199_v30 = vmax.bf16 %v3101_v21, %v3097_v29  ;;  %2240 = vperm.xlu1 %3069, %v2229_v57  }
 0x12e   :  { %v3608_v4 = vmax.bf16 %v3097_v29, %v1197_v63  ;;  %v1247_v47 = vsel %vm1239_vm3, %v3606_v25, 0  ;;  %v3619_v35 = vmax.bf16 %v3101_v21, %v1198_v33 }
 0x130   :  { %2981 = vmatmul.mubr.msk.bf16.vlgmr.msra.gmra.mxu1 %vm1232_vm4, %v3604_v24  ;;  %2983 = vmatprep.subr.msk.bf16.mxu0 %vm1239_vm3, %v3608_v4  ;;  %v1253_v44 = vsel %vm1239_vm3, %v3619_v35, 0  ;;  %v1250_v12 = vsel %vm1239_vm3, %v3608_v4, 0 }
 0x131   :  { %v3103_v46 = vpop.eup %3102  ;;  %1336 = vmatpush1.bf16.msra.mxu0 %v1247_v47  ;;  %1312 = vmatprep.mubr.bf16.mxu1 %v4179_v18 }
 0x132   :  { %v3622_v50 = vmax.bf16 %v3103_v46, %v1199_v30  ;;  %v1200_v49 = vmax.bf16 %v3103_v46, %v3101_v21  ;;  %2612 = vperm.xlu1 %3069, %v2602_v23  }
 0x133   :  { %v3105_v7 = vpop.eup %3104 }
 0x134   :  { %v3107_v19 = vpop.eup %3106  ;;  %2984 = vmatmul.mubr.msk.bf16.vlgmr.msra.gmra.mxu0 %vm1232_vm4, %v3604_v24  ;;  %2986 = vmatprep.subr.msk.bf16.mxu1 %vm1239_vm3, %v3622_v50  ;;  %v1201_v52 = vmax.bf16 %v3105_v7, %v3103_v46  ;;  %v3636_v53 = vmax.bf16 %v3105_v7, %v1200_v49  ;;  %v1256_v62 = vsel %vm1239_vm3, %v3622_v50, 0 }
 0x135   :  { %v3109_v55 = vpop.eup %3108  ;;  %1387 = vmatpush1.bf16.msra.mxu1 %v1253_v44  ;;  %1363 = vmatprep.mubr.bf16.mxu0 %v4179_v18  ;;  %v1202_v9 = vmax.bf16 %v3107_v19, %v3105_v7 }
 0x136   :  { %v3639_v56 = vmax.bf16 %v3107_v19, %v1201_v52  ;;  %v3111_v5 = vpop.eup %3110  ;;  %v1259_v58 = vsel %vm1239_vm3, %v3636_v53, 0  ;;  %v1203_v59 = vmax.bf16 %v3109_v55, %v3107_v19  ;;  %2622 = vperm.xlu1 %3069, %v2604_v60  }
 0x137   :  { %v1214_v48 = vmax.bf16 %v3109_v55, %v1202_v9  ;;  %v1193_v11 = vmax.bf16 %v3111_v5, %v3572_v41 }
 0x138   :  { %2982 = vmatmul.mubr.msk.bf16.gmra.mxu1 %vm1232_vm4, %v3078_v51  ;;  %2989 = vmatprep.subr.msk.bf16.mxu0 %vm1239_vm3, %v3639_v56  ;;  %v1262_v0 = vsel %vm1239_vm3, %v3639_v56, 0 }
 0x139   :  { %v3113_v8 = vpop.eup %3112  ;;  %1438 = vmatpush1.bf16.msra.mxu0 %v1259_v58  ;;  %1404 = vmatprep.mubr.bf16.mxu1 %v4179_v18  ;;  %v1265_v13 = vsel %vm1239_vm3, %v1214_v48, 0  ;;  %v1205_v38 = vmax.bf16 %v3566_v37, %v1193_v11  ;;  %v1244_v37 = vsel %vm1239_vm3, %v3592_v20, 0 }
 0x13a   :  { %2997 = vmatprep.subr.msk.bf16.mxu0 %vm1239_vm3, %v3582_v6  ;;  %v3652_v34 = vmax.bf16 %v3113_v8, %v1203_v59  ;;  %v1204_v39 = vmax.bf16 %v3113_v8, %v3109_v55 }
 0x13b   :  { %v3115_v10 = vpop.eup %3114  ;;  %v1540_v41 = vsel %vm1239_vm3, %v1205_v38, 0 }
 0x13c   :  { %2985 = vmatmul.mubr.msk.bf16.gmra.mxu0 %vm1232_vm4, %v3078_v51  ;;  %2992 = vmatprep.subr.msk.bf16.mxu1 %vm1239_vm3, %v3652_v34  ;;  %v3661_v36 = vmax.bf16 %v3115_v10, %v1204_v39  ;;  %v1268_v15 = vsel %vm1239_vm3, %v3652_v34, 0 }
 0x13d   :  { %1455 = vmatprep.mubr.bf16.mxu0 %v4179_v18 }
 0x140   :  { %2987 = vmatmul.mubr.msk.bf16.vlgmr.msra.gmra.mxu1 %vm1232_vm4, %v3604_v24 }
 0x141   :  { %1489 = vmatpush1.bf16.msra.mxu1 %v1265_v13  ;;  %1414 = vmatprep.mubr.bf16.mxu1 %v4179_v18 }
 0x142   :  { %3000 = vmatprep.subr.msk.bf16.mxu1 %vm1239_vm3, %v3606_v25 }
 0x144   :  { %2990 = vmatmul.mubr.msk.bf16.vlgmr.msra.gmra.mxu0 %vm1232_vm4, %v3604_v24 }
 0x145   :  { %1557 = vmatpush1.bf16.msra.mxu0 %v1540_v41  ;;  %1465 = vmatprep.mubr.bf16.mxu0 %v4179_v18 }
 0x146   :  { %3003 = vmatprep.subr.msk.bf16.mxu0 %vm1239_vm3, %v3619_v35 }
 0x148   :  { %2988 = vmatmul.mubr.msk.bf16.gmra.mxu1 %vm1232_vm4, %v3078_v51 }
 0x149   :  { %1506 = vmatprep.mubr.bf16.mxu1 %v4179_v18 }
 0x14c   :  { %2991 = vmatmul.mubr.msk.bf16.gmra.mxu0 %vm1232_vm4, %v3078_v51 }
 0x14d   :  { %1574 = vmatprep.mubr.bf16.mxu0 %v4179_v18 }
 0x150   :  { %2993 = vmatmul.mubr.msk.bf16.vlgmr.msra.gmra.mxu1 %vm1232_vm4, %v3604_v24 }
 0x151   :  { %1608 = vmatpush1.bf16.msra.mxu1 %v1244_v37  ;;  %1516 = vmatprep.mubr.bf16.mxu1 %v4179_v18 }
 0x152   :  { %3006 = vmatprep.subr.msk.bf16.mxu1 %vm1239_vm3, %v3636_v53 }
 0x154   :  { %2998 = vmatmul.mubr.msk.bf16.vlgmr.msra.gmra.mxu0 %vm1232_vm4, %v3079_v61 }
 0x155   :  { %1659 = vmatpush1.bf16.msra.mxu0 %v1250_v12  ;;  %1584 = vmatprep.mubr.bf16.mxu0 %v4179_v18 }
 0x156   :  { %3009 = vmatprep.subr.msk.bf16.mxu0 %vm1239_vm3, %v1214_v48 }
 0x158   :  { %2994 = vmatmul.mubr.msk.bf16.gmra.mxu1 %vm1232_vm4, %v3078_v51 }
 0x159   :  { %1625 = vmatprep.mubr.bf16.mxu1 %v4179_v18 }
 0x15c   :  { %2999 = vmatmul.mubr.msk.bf16.gmra.mxu0 %vm1232_vm4, %v3080_v43 }
 0x15d   :  { %1676 = vmatprep.mubr.bf16.mxu0 %v4179_v18 }
 0x160   :  { %3001 = vmatmul.mubr.msk.bf16.vlgmr.msra.gmra.mxu1 %vm1232_vm4, %v3079_v61 }
 0x161   :  { %1710 = vmatpush1.bf16.msra.mxu1 %v1256_v62  ;;  %1635 = vmatprep.mubr.bf16.mxu1 %v4179_v18 }
 0x162   :  { %3017 = vmatprep.subr.msk.bf16.mxu1 %vm1239_vm3, %v3606_v25 }
 0x164   :  { %3004 = vmatmul.mubr.msk.bf16.vlgmr.msra.gmra.mxu0 %vm1232_vm4, %v3079_v61 }
 0x165   :  { %1761 = vmatpush1.bf16.msra.mxu0 %v1262_v0  ;;  %1686 = vmatprep.mubr.bf16.mxu0 %v4179_v18 }
 0x166   :  { %3020 = vmatprep.subr.msk.bf16.mxu0 %vm1239_vm3, %v3619_v35 }
 0x168   :  { %3002 = vmatmul.mubr.msk.bf16.gmra.mxu1 %vm1232_vm4, %v3080_v43 }
 0x169   :  { %1727 = vmatprep.mubr.bf16.mxu1 %v4179_v18 }
 0x16c   :  { %3005 = vmatmul.mubr.msk.bf16.gmra.mxu0 %vm1232_vm4, %v3080_v43 }
 0x16d   :  { %1778 = vmatprep.mubr.bf16.mxu0 %v4179_v18 }
 0x170   :  { %3007 = vmatmul.mubr.msk.bf16.vlgmr.msra.gmra.mxu1 %vm1232_vm4, %v3079_v61 }
 0x171   :  { %1833 = vmatpush1.bf16.msra.mxu1 %v1244_v37  ;;  %1737 = vmatprep.mubr.bf16.mxu1 %v4179_v18 }
 0x172   :  { %3023 = vmatprep.subr.msk.bf16.mxu1 %vm1239_vm3, %v3636_v53 }
 0x174   :  { %3010 = vmatmul.mubr.msk.bf16.vlgmr.msra.gmra.mxu0 %vm1232_vm4, %v3079_v61 }
 0x175   :  { %1884 = vmatpush1.bf16.msra.mxu0 %v1250_v12  ;;  %1788 = vmatprep.mubr.bf16.mxu0 %v4179_v18 }
 0x176   :  { %3026 = vmatprep.subr.msk.bf16.mxu0 %vm1239_vm3, %v1214_v48 }
 0x178   :  { %3008 = vmatmul.mubr.msk.bf16.gmra.mxu1 %vm1232_vm4, %v3080_v43 }
 0x179   :  { %1850 = vmatprep.mubr.bf16.mxu1 %v4179_v18 }
 0x17c   :  { %3011 = vmatmul.mubr.msk.bf16.gmra.mxu0 %vm1232_vm4, %v3080_v43 }
 0x17d   :  { %1901 = vmatprep.mubr.bf16.mxu0 %v4179_v18 }
 0x180   :  { %3018 = vmatmul.mubr.msk.bf16.vlgmr.msra.gmra.mxu1 %vm1232_vm4, %v3081_v1 }
 0x181   :  { %1935 = vmatpush1.bf16.msra.mxu1 %v1256_v62  ;;  %1860 = vmatprep.mubr.bf16.mxu1 %v4179_v18 }
 0x182   :  { %3029 = vmatprep.subr.msk.bf16.mxu1 %vm1239_vm3, %v3661_v36 }
 0x184   :  { %3021 = vmatmul.mubr.msk.bf16.vlgmr.msra.gmra.mxu0 %vm1232_vm4, %v3081_v1 }
 0x185   :  { %1986 = vmatpush1.bf16.msra.mxu0 %v1262_v0  ;;  %1911 = vmatprep.mubr.bf16.mxu0 %v4179_v18 }
 0x188   :  { %3019 = vmatmul.mubr.msk.bf16.gmra.mxu1 %vm1232_vm4, %v3082_v26 }
 0x189   :  { %1952 = vmatprep.mubr.bf16.mxu1 %v4179_v18 }
 0x18c   :  { %3022 = vmatmul.mubr.msk.bf16.gmra.mxu0 %vm1232_vm4, %v3082_v26 }
 0x18d   :  { %2003 = vmatprep.mubr.bf16.mxu0 %v4179_v18 }
 0x190   :  { %3024 = vmatmul.mubr.msk.bf16.vlgmr.msra.gmra.mxu1 %vm1232_vm4, %v3081_v1 }
 0x191   :  { %2037 = vmatpush1.bf16.msra.mxu1 %v1268_v15  ;;  %1962 = vmatprep.mubr.bf16.mxu1 %v4179_v18 }
 0x194   :  { %3027 = vmatmul.mubr.msk.bf16.vlgmr.msra.gmra.mxu0 %vm1232_vm4, %v3081_v1 }
 0x195   :  { %2013 = vmatprep.mubr.bf16.mxu0 %v4179_v18 }
 0x198   :  { %3025 = vmatmul.mubr.msk.bf16.gmra.mxu1 %vm1232_vm4, %v3082_v26 }
 0x199   :  { %2054 = vmatprep.mubr.bf16.mxu1 %v4179_v18 }
 0x19c   :  { %3028 = vmatmul.mubr.msk.bf16.gmra.mxu0 %vm1232_vm4, %v3082_v26 }
 0x19d   :  { %2337 = vmatprep.mubr.bf16.mxu0 %v4179_v18 }
 0x1a0   :  { %3030 = vmatmul.mubr.msk.bf16.vlgmr.msra.gmra.mxu1 %vm1232_vm4, %v3081_v1 }
 0x1a1   :  { %2064 = vmatprep.mubr.bf16.mxu1 %v4179_v18 }
 0x1a8   :  { %3031 = vmatmul.mubr.msk.bf16.gmra.mxu1 %vm1232_vm4, %v3082_v26 }
 0x1a9   :  { %2398 = vmatprep.mubr.bf16.mxu1 %v4179_v18 }
 0x1f0   :  { %v3763_v40 = vpop.f32.mrf.mxu1 }
 0x1f2   :  { %v3765_v2 = vpop.f32.mrf.mxu1 }
 0x1f4   :  { %v3767_v6 = vpop.f32.mrf.mxu1  ;;  %v3769_v27 = vpop.f32.mrf.mxu0 }
 0x1f6   :  { %v3771_v17 = vpop.f32.mrf.mxu1  ;;  %v3773_v42 = vpop.f32.mrf.mxu0 }
 0x1f8   :  { %v3775_v3 = vpop.f32.mrf.mxu1  ;;  %v3777_v28 = vpop.f32.mrf.mxu0 }
 0x1fa   :  { %v3779_v29 = vpop.f32.mrf.mxu1  ;;  %v3781_v20 = vpop.f32.mrf.mxu0 }
 0x1fc   :  { %v1318_v14 = vpop.f32.mrf.mxu1  ;;  %v3783_v45 = vpop.f32.mrf.mxu0 }
 0x1fe   :  { %v1319_v31 = vpop.f32.mrf.mxu1  ;;  %v3785_v54 = vpop.f32.mrf.mxu0 }
 0x200   :  { %v1369_v22 = vpop.f32.mrf.mxu0  ;;  %v3787_v24 = vpop.f32.mrf.mxu1 }
 0x202   :  { %v1370_v63 = vpop.f32.mrf.mxu0  ;;  %v3789_v25 = vpop.f32.mrf.mxu1 }
 0x204   :  { %v3791_v33 = vpop.f32.mrf.mxu1  ;;  %v3793_v21 = vpop.f32.mrf.mxu0 }
 0x206   :  { %v3795_v4 = vpop.f32.mrf.mxu1  ;;  %v3797_v16 = vpop.f32.mrf.mxu0 }
 0x208   :  { %v3799_v47 = vpop.f32.mrf.mxu1  ;;  %v3801_v30 = vpop.f32.mrf.mxu0 }
 0x20a   :  { %v3803_v35 = vpop.f32.mrf.mxu1  ;;  %v3805_v46 = vpop.f32.mrf.mxu0 }
 0x20c   :  { %v1420_v50 = vpop.f32.mrf.mxu1  ;;  %v3807_v49 = vpop.f32.mrf.mxu0 }
 0x20e   :  { %v1421_v7 = vpop.f32.mrf.mxu1  ;;  %v3809_v32 = vpop.f32.mrf.mxu0 }
 0x210   :  { %v1471_v19 = vpop.f32.mrf.mxu0  ;;  %v3811_v44 = vpop.f32.mrf.mxu1 }
 0x211   :  { %4180 = vst [vmem:[#allocation2_spill] sm:$0xff] %v3811_v44 }
 0x212   :  { %v1472_v51 = vpop.f32.mrf.mxu0  ;;  %v3813_v52 = vpop.f32.mrf.mxu1 }
 0x213   :  { %4181 = vst [vmem:[#allocation9_spill] sm:$0xff] %v3813_v52 }
 0x214   :  { %v3815_v53 = vpop.f32.mrf.mxu1  ;;  %v1576_v55 = vpop.f32.mrf.mxu0 }
 0x215   :  { %4182 = vst [vmem:[#allocation3_spill] sm:$0xff] %v3815_v53 }
 0x216   :  { %v3817_v56 = vpop.f32.mrf.mxu1  ;;  %v1578_v57 = vpop.f32.mrf.mxu0 }
 0x217   :  { %4183 = vst [vmem:[#allocation6_spill] sm:$0xff] %v3817_v56 }
 0x218   :  { %v3819_v5 = vpop.f32.mrf.mxu1  ;;  %v1580_v58 = vpop.f32.mrf.mxu0 }
 0x219   :  { %4184 = vst [vmem:[#allocation4_spill] sm:$0xff] %v3819_v5  ;;  %v1577_v5 = vadd.f32 %v1576_v55, %v3763_v40 }
 0x21a   :  { %v3821_v59 = vpop.f32.mrf.mxu1  ;;  %v1582_v9 = vpop.f32.mrf.mxu0 }
 0x21b   :  { %4185 = vst [vmem:[#allocation8_spill] sm:$0xff] %v3821_v59 }
 0x21c   :  { %v1522_v8 = vpop.f32.mrf.mxu1  ;;  %v1586_v34 = vpop.f32.mrf.mxu0 }
 0x21e   :  { %v1523_v39 = vpop.f32.mrf.mxu1  ;;  %v1588_v10 = vpop.f32.mrf.mxu0 }
 0x220   :  { %v1590_v23 = vpop.f32.mrf.mxu0  ;;  %v1627_v48 = vpop.f32.mrf.mxu1 }
 0x221   :  { %v1628_v44 = vadd.f32 %v1627_v48, %v3769_v27 }
 0x222   :  { %v1591_v11 = vpop.f32.mrf.mxu0  ;;  %v1629_v36 = vpop.f32.mrf.mxu1 }
 0x224   :  { %v1631_v60 = vpop.f32.mrf.mxu1  ;;  %v3823_v13 = vpop.f32.mrf.mxu0 }
 0x226   :  { %v1633_v38 = vpop.f32.mrf.mxu1  ;;  %v3825_v41 = vpop.f32.mrf.mxu0 }
 0x228   :  { %v1637_v37 = vpop.f32.mrf.mxu1  ;;  %v3827_v61 = vpop.f32.mrf.mxu0 }
 0x22a   :  { %v1639_v12 = vpop.f32.mrf.mxu1  ;;  %v3829_v43 = vpop.f32.mrf.mxu0 }
 0x22c   :  { %v1641_v62 = vpop.f32.mrf.mxu1  ;;  %v3831_v0 = vpop.f32.mrf.mxu0 }
 0x22e   :  { %v1642_v1 = vpop.f32.mrf.mxu1  ;;  %v3833_v26 = vpop.f32.mrf.mxu0 }
 0x22f   :  { %v3857_v1 = vpop.permute.xlu1 %2118 }
 0x230   :  { %v1692_v15 = vpop.f32.mrf.mxu0  ;;  %v3835_v14 = vpop.f32.mrf.mxu1 }
 0x232   :  { %v1693_v31 = vpop.f32.mrf.mxu0  ;;  %v3837_v22 = vpop.f32.mrf.mxu1 }
 0x234   :  { %v3839_v63 = vpop.f32.mrf.mxu1  ;;  %v3841_v50 = vpop.f32.mrf.mxu0 }
 0x235   :  { %4186 = vst [vmem:[#allocation7_spill] sm:$0xff] %v3841_v50  ;;  %v3866_v50 = vpop.permute.xlu0 %2113 }
 0x236   :  { %v3843_v7 = vpop.f32.mrf.mxu1  ;;  %v3845_v19 = vpop.f32.mrf.mxu0 }
 0x237   :  { %4187 = vst [vmem:[#allocation5_spill] sm:$0xff] %v3845_v19  ;;  %v1581_v19 = vadd.f32 %v1580_v58, %v3767_v6  ;;  %v1630_v58 = vadd.f32 %v1629_v36, %v3773_v42  ;;  %v1640_v42 = vadd.f32 %v1639_v12, %v3785_v54 }
 0x238   :  { %v3847_v51 = vpop.f32.mrf.mxu1  ;;  %v3849_v8 = vpop.f32.mrf.mxu0 }
 0x239   :  { %4188 = vst [vmem:[#allocation10_spill] sm:$0xff] %v3849_v8  ;;  %v1579_v8 = vadd.f32 %v1578_v57, %v3765_v2 }
 0x23a   :  { %v3851_v39 = vpop.f32.mrf.mxu1  ;;  %v3853_v23 = vpop.f32.mrf.mxu0 }
 0x23b   :  { %4189 = vst [vmem:[#allocation11_spill] sm:$0xff] %v3853_v23  ;;  %v3864_v23 = vpop.permute.xlu1 %2108 }
 0x23c   :  { %v1743_v11 = vpop.f32.mrf.mxu1  ;;  %v3855_v62 = vpop.f32.mrf.mxu0 }
 0x23d   :  { %4190 = vst [vmem:[#allocation12_spill] sm:$0xff] %v3855_v62 }
 0x23e   :  { %v1744_v15 = vpop.f32.mrf.mxu1  ;;  %v3859_v31 = vpop.f32.mrf.mxu0 }
 0x23f   :  { %4191 = vst [vmem:[#allocation13_spill] sm:$0xff] %v3859_v31  ;;  %v1583_v15 = vadd.f32 %v1582_v9, %v3771_v17 }
 0x240   :  { %v1794_v18 = vpop.f32.mrf.mxu0  ;;  %v1852_v59 = vpop.f32.mrf.mxu1 }
 0x241   :  { %v2073_v52 = vadd.f32 %v1852_v59, %v1577_v5  ;;  %v1589_v5 = vadd.f32 %v1588_v10, %v3779_v29  ;;  %v1632_v59 = vadd.f32 %v1631_v60, %v3777_v28 }
 0x242   :  { %v1795_v56 = vpop.f32.mrf.mxu0  ;;  %v1854_v53 = vpop.f32.mrf.mxu1 }
 0x243   :  { %v2074_v31 = vadd.f32 %v1854_v53, %v1579_v8  ;;  %v1587_v56 = vadd.f32 %v1586_v34, %v3775_v3  ;;  %v2121_v2 = vadd.f32 %v3864_v23, %v2073_v52  ;;  %v1634_v52 = vadd.f32 %v1633_v38, %v3781_v20 }
 0x244   :  { %v1856_v11 = vpop.f32.mrf.mxu1  ;;  %v1903_v62 = vpop.f32.mrf.mxu0  ;;  %v1638_v34 = vadd.f32 %v1637_v37, %v3783_v45 }
 0x245   :  { %v2083_v18 = vadd.f32 %v1856_v11, %v1581_v19  ;;  %v2075_v17 = vadd.f32 %v1903_v62, %v1628_v44  ;;  %v2122_v27 = vadd.f32 %v3864_v23, %v2074_v31 }
 0x246   :  { %v1858_v40 = vpop.f32.mrf.mxu1  ;;  %v1905_v55 = vpop.f32.mrf.mxu0 }
 0x247   :  { %v2131_v6 = vadd.f32 %v3866_v50, %v2083_v18  ;;  %v2084_v57 = vadd.f32 %v1858_v40, %v1583_v15  ;;  %v2076_v8 = vadd.f32 %v1905_v55, %v1630_v58  ;;  %v2123_v60 = vadd.f32 %v3864_v23, %v2075_v17 }
 0x248   :  { %v1862_v53 = vpop.f32.mrf.mxu1  ;;  %v1907_v9 = vpop.f32.mrf.mxu0 }
 0x249   :  { %v2151_v48 = vpack.c.bf16 %v2131_v6, %v2121_v2  ;;  %v2132_v19 = vadd.f32 %v3866_v50, %v2084_v57  ;;  %v2093_v3 = vadd.f32 %v1862_v53, %v1587_v56  ;;  %v2085_v11 = vadd.f32 %v1907_v9, %v1632_v59 }
 0x24a   :  { %v1864_v29 = vpop.f32.mrf.mxu1  ;;  %v1909_v10 = vpop.f32.mrf.mxu0  ;;  %v2124_v18 = vadd.f32 %v3864_v23, %v2076_v8  ;;  %v1679_v59 = vadd.f32 %v3823_v13, %v3787_v24  ;;  %v1681_v9 = vadd.f32 %v3825_v41, %v3789_v25  ;;  %v1685_v24 = vadd.f32 %v3829_v43, %v3795_v4 }
 0x24b   :  { %v2152_v28 = vpack.c.bf16 %v2132_v19, %v2122_v27  ;;  %v2141_v44 = vadd.f32 %v3857_v1, %v2093_v3  ;;  %v2094_v36 = vadd.f32 %v1864_v29, %v1589_v5  ;;  %3116 = vtanh.bf16 %v2151_v48 }
 0x24c   :  { %v2133_v62 = vadd.f32 %v3866_v50, %v2085_v11  ;;  %v2086_v31 = vadd.f32 %v1909_v10, %v1634_v52  ;;  %v1866_v15 = vpop.f32.mrf.mxu1  ;;  %v1913_v20 = vpop.f32.mrf.mxu0  ;;  %v1683_v19 = vadd.f32 %v3827_v61, %v3791_v33  ;;  %v1689_v25 = vadd.f32 %v3831_v0, %v3799_v47 }
 0x24d   :  { %3118 = vtanh.bf16 %v2152_v28  ;;  %v2161_v45 = vpack.c.bf16 %v2141_v44, %v2141_v44  ;;  %v2142_v38 = vadd.f32 %v3857_v1, %v2094_v36  ;;  %v2095_v37 = vadd.f32 %v1913_v20, %v1638_v34 }
 0x24e   :  { %v2153_v54 = vpack.c.bf16 %v2133_v62, %v2123_v60  ;;  %v2134_v12 = vadd.f32 %v3866_v50, %v2086_v31  ;;  %v1867_v40 = vpop.f32.mrf.mxu1  ;;  %v1915_v55 = vpop.f32.mrf.mxu0  ;;  %v1730_v41 = vadd.f32 %v3835_v14, %v3793_v21  ;;  %v1691_v33 = vadd.f32 %v3833_v26, %v3803_v35 }
 0x24f   :  { %3120 = vtanh.bf16 %v2161_v45  ;;  %v2162_v56 = vpack.c.bf16 %v2142_v38, %v2142_v38  ;;  %v2143_v2 = vadd.f32 %v3857_v1, %v2095_v37  ;;  %v2096_v6 = vadd.f32 %v1915_v55, %v1640_v42  ;;  %v4192_v55 = vld [vmem:[#allocation2_spill] sm:$0xff] }
 0x250   :  { %3122 = vtanh.bf16 %v2153_v54  ;;  %v2154_v57 = vpack.c.bf16 %v2134_v12, %v2124_v18  ;;  %v1917_v5 = vpop.f32.mrf.mxu0  ;;  %v1954_v58 = vpop.f32.mrf.mxu1  ;;  %v1732_v4 = vadd.f32 %v3837_v22, %v3797_v16  ;;  %v1734_v43 = vadd.f32 %v3839_v63, %v3801_v30 }
 0x251   :  { %3124 = vtanh.bf16 %v2162_v56  ;;  %v2163_v17 = vpack.c.bf16 %v2143_v2, %v2143_v2  ;;  %v2144_v53 = vadd.f32 %v3857_v1, %v2096_v6  ;;  %v2077_v52 = vadd.f32 %v1954_v58, %v1679_v59  ;;  %v4193_v56 = vld [vmem:[#allocation7_spill] sm:$0xff] }
 0x252   :  { %3126 = vtanh.bf16 %v2154_v57  ;;  %v1918_v27 = vpop.f32.mrf.mxu0  ;;  %v1956_v48 = vpop.f32.mrf.mxu1  ;;  %v1736_v47 = vadd.f32 %v3843_v7, %v3805_v46  ;;  %v1740_v62 = vadd.f32 %v3847_v51, %v3807_v49  ;;  %v1742_v16 = vadd.f32 %v3851_v39, %v3809_v32 }
 0x253   :  { %3128 = vtanh.bf16 %v2163_v17  ;;  %v2164_v3 = vpack.c.bf16 %v2144_v53, %v2144_v53  ;;  %v2078_v13 = vadd.f32 %v1956_v48, %v1681_v9  ;;  %v2125_v61 = vadd.f32 %v3864_v23, %v2077_v52 }
 0x254   :  { %v1958_v34 = vpop.f32.mrf.mxu1  ;;  %v2005_v8 = vpop.f32.mrf.mxu0  ;;  %v1781_v2 = vadd.f32 %v4193_v56, %v4192_v55 }
 0x255   :  { %3130 = vtanh.bf16 %v2164_v3  ;;  %v2087_v11 = vadd.f32 %v1958_v34, %v1683_v19  ;;  %v2079_v21 = vadd.f32 %v2005_v8, %v1730_v41  ;;  %v2126_v44 = vadd.f32 %v3864_v23, %v2078_v13  ;;  %v4194_v13 = vld [vmem:[#allocation9_spill] sm:$0xff] }
 0x256   :  { %v1960_v29 = vpop.f32.mrf.mxu1  ;;  %v2007_v10 = vpop.f32.mrf.mxu0 }
 0x257   :  { %v2135_v42 = vadd.f32 %v3866_v50, %v2087_v11  ;;  %v2088_v28 = vadd.f32 %v1960_v29, %v1685_v24  ;;  %v2080_v30 = vadd.f32 %v2007_v10, %v1732_v4  ;;  %v2127_v45 = vadd.f32 %v3864_v23, %v2079_v21  ;;  %v4195_v11 = vld [vmem:[#allocation5_spill] sm:$0xff] }
 0x258   :  { %v1964_v0 = vpop.f32.mrf.mxu1  ;;  %v2009_v14 = vpop.f32.mrf.mxu0 }
 0x259   :  { %v2155_v35 = vpack.c.bf16 %v2135_v42, %v2125_v61  ;;  %v2136_v26 = vadd.f32 %v3866_v50, %v2088_v28  ;;  %v2097_v36 = vadd.f32 %v1964_v0, %v1689_v25  ;;  %v3117_v60 = vpop.eup %3116  ;;  %v2089_v22 = vadd.f32 %v2009_v14, %v1734_v43  ;;  %v4196_v43 = vld [vmem:[#allocation3_spill] sm:$0xff] }
 0x25a   :  { %v1966_v63 = vpop.f32.mrf.mxu1  ;;  %v2011_v46 = vpop.f32.mrf.mxu0  ;;  %v2128_v6 = vadd.f32 %v3864_v23, %v2080_v30  ;;  %v1783_v25 = vadd.f32 %v4195_v11, %v4194_v13  ;;  %v4204_v13 = vmov 0  }
 0x25b   :  { %v3119_v7 = vpop.eup %3118  ;;  %3132 = vtanh.bf16 %v2155_v35  ;;  %v2156_v31 = vpack.c.bf16 %v2136_v26, %v2126_v44  ;;  %v2145_v15 = vadd.f32 %v3857_v1, %v2097_v36  ;;  %v2098_v20 = vadd.f32 %v1966_v63, %v1691_v33  ;;  %v4198_v44 = vld [vmem:[#allocation6_spill] sm:$0xff]  ;;  %v4199_v35 = vld [vmem:[#allocation11_spill] sm:$0xff] }
 0x25c   :  { %v2137_v38 = vadd.f32 %v3866_v50, %v2089_v22  ;;  %v2090_v37 = vadd.f32 %v2011_v46, %v1736_v47  ;;  %v1968_v18 = vpop.f32.mrf.mxu1  ;;  %v2015_v49 = vpop.f32.mrf.mxu0  ;;  %v2191_v51 = vmax.bf16 %v3119_v7, %v3117_v60  ;;  %v4197_v47 = vld [vmem:[#allocation10_spill] sm:$0xff]  ;;  %v1787_v26 = vadd.f32 %v4199_v35, %v4198_v44  ;;  %v3085_v35 = vld [vmem:[%s4155_s5 + $0x10] ss:$0 sps:$4 sm:$0xff]  }
 0x25d   :  { %v3121_v54 = vpop.eup %3120  ;;  %3134 = vtanh.bf16 %v2156_v31  ;;  %v2165_v32 = vpack.c.bf16 %v2145_v15, %v2145_v15  ;;  %v2146_v39 = vadd.f32 %v3857_v1, %v2098_v20  ;;  %v2099_v12 = vadd.f32 %v2015_v49, %v1740_v62  ;;  %v4200_v31 = vld [vmem:[#allocation4_spill] sm:$0xff]  ;;  %v4203_v49 = vld [vmem:[#allocation13_spill] sm:$0xff] }
 0x25e   :  { %v3921_v40 = vpop.eup %3122  ;;  %v2157_v57 = vpack.c.bf16 %v2137_v38, %v2127_v45  ;;  %v2138_v5 = vadd.f32 %v3866_v50, %v2090_v37  ;;  %v1969_v58 = vpop.f32.mrf.mxu1  ;;  %v1785_v21 = vadd.f32 %v4197_v47, %v4196_v43  ;;  %v4201_v15 = vld [vmem:[#allocation12_spill] sm:$0xff] }
 0x25f   :  { %v2017_v59 = vpop.f32.mrf.mxu0  ;;  %v3125_v17 = vpop.eup %3124  ;;  %3136 = vtanh.bf16 %v2165_v32  ;;  %v2166_v53 = vpack.c.bf16 %v2146_v39, %v2146_v39  ;;  %v2147_v9 = vadd.f32 %v3857_v1, %v2099_v12  ;;  %v2192_v8 = vmax.bf16 %v3921_v40, %v3119_v7  ;;  %v4202_v18 = vld [vmem:[#allocation8_spill] sm:$0xff] }
 0x260   :  { %v2100_v27 = vadd.f32 %v2017_v59, %v1742_v16  ;;  %v3127_v48 = vpop.eup %3126  ;;  %3138 = vtanh.bf16 %v2157_v57  ;;  %v2158_v19 = vpack.c.bf16 %v2138_v5, %v2128_v6  ;;  %v2056_v3 = vpop.f32.mrf.mxu1  ;;  %v2199_v34 = vmax.bf16 %v3125_v17, %v3121_v54 }
 0x261   :  { %v2019_v52 = vpop.f32.mrf.mxu0  ;;  %v3929_v24 = vpop.eup %3128  ;;  %3140 = vtanh.bf16 %v2166_v53  ;;  %v2167_v41 = vpack.c.bf16 %v2147_v9, %v2147_v9  ;;  %v2208_v28 = vmax.bf16 %v3127_v48, %v2192_v8  ;;  %v2081_v14 = vadd.f32 %v2056_v3, %v1781_v2  ;;  %v3956_v2 = vld [vmem:[%s4155_s5] sm:$0xff]  }
 0x262   :  { %v2148_v29 = vadd.f32 %v3857_v1, %v2100_v27  ;;  %3142 = vtanh.bf16 %v2158_v19  ;;  %v2058_v10 = vpop.f32.mrf.mxu1  ;;  %v2200_v61 = vmax.bf16 %v3929_v24, %v3125_v17  ;;  %v2215_v42 = vmax.bf16 %v3929_v24, %v2199_v34 }
 0x263   :  { %v2020_v33 = vpop.f32.mrf.mxu0  ;;  %v3131_v4 = vpop.eup %3130  ;;  %3144 = vtanh.bf16 %v2167_v41  ;;  %v2207_v62 = vmax.bf16 %v3921_v40, %v2191_v51  ;;  %v2082_v30 = vadd.f32 %v2058_v10, %v1783_v25  ;;  %v2193_v63 = vmax.bf16 %v3127_v48, %v3921_v40 }
 0x264   :  { %v2168_v0 = vpack.c.bf16 %v2148_v29, %v2148_v29  ;;  %v2060_v36 = vpop.f32.mrf.mxu1  ;;  %v2216_v60 = vmax.bf16 %v3131_v4, %v2200_v61  ;;  %v2201_v16 = vmax.bf16 %v3131_v4, %v3929_v24  ;;  %v2282_v7 = vsel %vm123_vm1, %v2215_v42, 0 }
 0x265   :  { %v2091_v22 = vadd.f32 %v2060_v36, %v1785_v21  ;;  %v1791_v20 = vadd.f32 %v4201_v15, %v4200_v31  ;;  %v2129_v45 = vadd.f32 %v3864_v23, %v2081_v14  ;;  %v1793_v51 = vadd.f32 %v4203_v49, %v4202_v18 }
 0x266   :  { %3146 = vtanh.bf16 %v2168_v0  ;;  %v2062_v46 = vpop.f32.mrf.mxu1  ;;  %3035 = vmatprep.subr.msk.bf16.mxu0 %vm123_vm1, %v2216_v60  ;;  %v2130_v39 = vadd.f32 %v3864_v23, %v2082_v30 }
 0x267   :  { %v2139_v38 = vadd.f32 %v3866_v50, %v2091_v22  ;;  %v2092_v37 = vadd.f32 %v2062_v46, %v1787_v26  ;;  %2318 = vmatpush1.bf16.msra.mxu0 %v2282_v7 }
 0x268   :  { %v2066_v54 = vpop.f32.mrf.mxu1  ;;  %2319 = vmatprep.subr.bf16.mxu0 %v2208_v28  ;;  %v3084_v28 = vld [vmem:[%s4155_s5 + $0x8] sm:$0xff]  }
 0x269   :  { %v3133_v32 = vpop.eup %3132  ;;  %v2159_v12 = vpack.c.bf16 %v2139_v38, %v2129_v45  ;;  %v2140_v40 = vadd.f32 %v3866_v50, %v2092_v37  ;;  %v2101_v55 = vadd.f32 %v2066_v54, %v1791_v20  ;;  %v4000_v38 = vpop.permute.xlu1 %2255 }
 0x26a   :  { %v2068_v56 = vpop.f32.mrf.mxu1  ;;  %v2194_v6 = vmax.bf16 %v3133_v32, %v3127_v48  ;;  %v2209_v57 = vmax.bf16 %v3133_v32, %v2193_v63 }
 0x26b   :  { %v3135_v5 = vpop.eup %3134  ;;  %3148 = vtanh.bf16 %v2159_v12  ;;  %v2160_v58 = vpack.c.bf16 %v2140_v40, %v2130_v39  ;;  %v2149_v59 = vadd.f32 %v3857_v1, %v2101_v55  ;;  %v2102_v17 = vadd.f32 %v2068_v56, %v1793_v51  ;;  %2320 = vmatpush1.bf16.msra.mxu0 %v2207_v62  ;;  %v4006_v12 = vpop.permute.xlu0 %2245 }
 0x26c   :  { %v2070_v23 = vpop.f32.mrf.mxu1  ;;  %v2210_v53 = vmax.bf16 %v3135_v5, %v2194_v6  ;;  %v2195_v50 = vmax.bf16 %v3135_v5, %v3133_v32 }
 0x26d   :  { %v3137_v9 = vpop.eup %3136  ;;  %3150 = vtanh.bf16 %v2160_v58  ;;  %v2169_v27 = vpack.c.bf16 %v2149_v59, %v2149_v59  ;;  %v2150_v19 = vadd.f32 %v3857_v1, %v2102_v17  ;;  %v4004_v54 = vpop.permute.xlu1 %2250 }
 0x26e   :  { %v3139_v3 = vpop.eup %3138  ;;  %v2071_v52 = vpop.f32.mrf.mxu1  ;;  %3036 = vmatmul.mubr.msk.bf16.vlgmr.msra.gmra.mxu0 %vm2271_vm5, %v3956_v2  ;;  %v2202_v48 = vmax.bf16 %v3137_v9, %v3131_v4  ;;  %v2217_v34 = vmax.bf16 %v3137_v9, %v2201_v16 }
 0x26f   :  { %v3141_v8 = vpop.eup %3140  ;;  %3152 = vtanh.bf16 %v2169_v27  ;;  %v2170_v24 = vpack.c.bf16 %v2150_v19, %v2150_v19  ;;  %2347 = vmatprep.mubr.bf16.mxu0 %v4204_v13  ;;  %v2196_v11 = vmax.bf16 %v3139_v3, %v3135_v5  ;;  %v2211_v25 = vmax.bf16 %v3139_v3, %v2195_v50 }
 0x270   :  { %v3143_v41 = vpop.eup %3142  ;;  %v2218_v29 = vmax.bf16 %v3141_v8, %v2202_v48  ;;  %v2203_v10 = vmax.bf16 %v3141_v8, %v3137_v9  ;;  %v2288_v42 = vsel %vm123_vm1, %v2217_v34, 0  ;;  %v4015_v9 = vpop.permute.xlu0 %2235 }
 0x271   :  { %v3145_v33 = vpop.eup %3144  ;;  %3154 = vtanh.bf16 %v2170_v24  ;;  %v2212_v1 = vmax.bf16 %v3143_v41, %v2196_v11  ;;  %v2197_v61 = vmax.bf16 %v3143_v41, %v3139_v3  ;;  %v4010_v5 = vpop.permute.xlu1 %2240 }
 0x272   :  { %3039 = vmatprep.subr.msk.bf16.mxu1 %vm123_vm1, %v2218_v29  ;;  %v2204_v4 = vmax.bf16 %v3145_v33, %v3141_v8  ;;  %v2219_v43 = vmax.bf16 %v3145_v33, %v2203_v10 }
 0x273   :  { %2379 = vmatpush1.bf16.msra.mxu1 %v2288_v42 }
 0x274   :  { %v3147_v47 = vpop.eup %3146  ;;  %2380 = vmatprep.subr.bf16.mxu1 %v2210_v53  ;;  %v2294_v14 = vsel %vm123_vm1, %v2219_v43, 0 }
 0x275   :  { %v2220_v21 = vmax.bf16 %v3147_v47, %v2204_v4  ;;  %v2205_v0 = vmax.bf16 %v3147_v47, %v3145_v33 }
 0x276   :  { %3037 = vmatmul.mubr.msk.bf16.gmra.mxu0 %vm2271_vm5, %v3084_v28 }
 0x277   :  { %3043 = vmatprep.subr.msk.bf16.mxu0 %vm123_vm1, %v2220_v21  ;;  %2381 = vmatpush1.bf16.msra.mxu1 %v2209_v57 }
 0x278   :  { %2440 = vmatpush1.bf16.msra.mxu0 %v2294_v14  ;;  %2357 = vmatprep.mubr.bf16.mxu0 %v4204_v13 }
 0x279   :  { %2441 = vmatprep.subr.bf16.mxu0 %v2212_v1  ;;  %v3149_v44 = vpop.eup %3148 }
 0x27a   :  { %3040 = vmatmul.mubr.msk.bf16.vlgmr.msra.gmra.mxu1 %vm2271_vm5, %v3956_v2  ;;  %v2198_v26 = vmax.bf16 %v3149_v44, %v3143_v41  ;;  %v2213_v36 = vmax.bf16 %v3149_v44, %v2197_v61 }
 0x27b   :  { %v3151_v60 = vpop.eup %3150  ;;  %2408 = vmatprep.mubr.bf16.mxu1 %v4204_v13 }
 0x27c   :  { %2442 = vmatpush1.bf16.msra.mxu0 %v2211_v25  ;;  %v2214_v62 = vmax.bf16 %v3151_v60, %v2198_v26 }
 0x27d   :  { %v3153_v16 = vpop.eup %3152 }
 0x27e   :  { %3038 = vmatmul.mubr.msk.bf16.gmra.mxu0 %vm2271_vm5, %v3085_v35  ;;  %v2206_v30 = vmax.bf16 %v3153_v16, %v3147_v47  ;;  %v2221_v22 = vmax.bf16 %v3153_v16, %v2205_v0 }
 0x27f   :  { %v3155_v63 = vpop.eup %3154  ;;  %2459 = vmatprep.mubr.bf16.mxu0 %v4204_v13 }
 0x280   :  { %v2222_v46 = vmax.bf16 %v3155_v63, %v2206_v30  ;;  %v2300_v7 = vsel %vm123_vm1, %v2221_v22, 0 }
 0x282   :  { %3041 = vmatmul.mubr.msk.bf16.gmra.mxu1 %vm2271_vm5, %v3084_v28  ;;  %3047 = vmatprep.subr.msk.bf16.mxu1 %vm123_vm1, %v2222_v46 }
 0x283   :  { %2501 = vmatpush1.bf16.msra.mxu1 %v2300_v7  ;;  %2418 = vmatprep.mubr.bf16.mxu1 %v4204_v13 }
 0x284   :  { %2502 = vmatprep.subr.bf16.mxu1 %v2214_v62 }
 0x286   :  { %3044 = vmatmul.mubr.msk.bf16.vlgmr.msra.gmra.mxu0 %vm2271_vm5, %v3956_v2 }
 0x287   :  { %2503 = vmatpush1.bf16.msra.mxu1 %v2213_v36  ;;  %2469 = vmatprep.mubr.bf16.mxu0 %v4204_v13 }
 0x28a   :  { %3042 = vmatmul.mubr.msk.bf16.gmra.mxu1 %vm2271_vm5, %v3085_v35 }
 0x28b   :  { %2520 = vmatprep.mubr.bf16.mxu1 %v4204_v13 }
 0x28e   :  { %3045 = vmatmul.mubr.msk.bf16.gmra.mxu0 %vm2271_vm5, %v3084_v28 }
 0x28f   :  { %2479 = vmatprep.mubr.bf16.mxu0 %v4204_v13 }
 0x292   :  { %3048 = vmatmul.mubr.msk.bf16.vlgmr.msra.gmra.mxu1 %vm2271_vm5, %v3956_v2 }
 0x293   :  { %2530 = vmatprep.mubr.bf16.mxu1 %v4204_v13 }
 0x296   :  { %3046 = vmatmul.mubr.msk.bf16.gmra.mxu0 %vm2271_vm5, %v3085_v35 }
 0x297   :  { %2699 = vmatprep.mubr.bf16.mxu0 %v4204_v13 }
 0x29a   :  { %3049 = vmatmul.mubr.msk.bf16.gmra.mxu1 %vm2271_vm5, %v3084_v28 }
 0x29b   :  { %2540 = vmatprep.mubr.bf16.mxu1 %v4204_v13 }
 0x2a2   :  { %3050 = vmatmul.mubr.msk.bf16.gmra.mxu1 %vm2271_vm5, %v3085_v35 }
 0x2a3   :  { %2752 = vmatprep.mubr.bf16.mxu1 %v4204_v13 }
 0x32e   :  { %v2339_v31 = vpop.f32.mrf.mxu0 }
 0x32f   :  { %v2340_v10 = vadd.f32 %v2339_v31, %v4015_v9 }
 0x330   :  { %v2341_v15 = vpop.f32.mrf.mxu0 }
 0x331   :  { %v2342_v8 = vadd.f32 %v2341_v15, %v4015_v9 }
 0x332   :  { %v2343_v20 = vpop.f32.mrf.mxu0 }
 0x333   :  { %v2344_v24 = vadd.f32 %v2343_v20, %v4010_v5 }
 0x334   :  { %v2345_v45 = vpop.f32.mrf.mxu0 }
 0x335   :  { %v2346_v27 = vadd.f32 %v2345_v45, %v4010_v5  ;;  %v2549_v61 = vpack.c.bf16 %v2344_v24, %v2340_v10 }
 0x336   :  { %v2349_v37 = vpop.f32.mrf.mxu0 }
 0x337   :  { %v2350_v52 = vadd.f32 %v2349_v37, %v4006_v12  ;;  %v2550_v29 = vpack.c.bf16 %v2346_v27, %v2342_v8 }
 0x338   :  { %v2351_v18 = vpop.f32.mrf.mxu0 }
 0x339   :  { %v2352_v58 = vadd.f32 %v2351_v18, %v4006_v12 }
 0x33a   :  { %v2353_v49 = vpop.f32.mrf.mxu0  ;;  %v4002_v51 = vpop.f32.mrf.mxu1 }
 0x33b   :  { %v2354_v23 = vadd.f32 %v2353_v49, %v4004_v54  ;;  %v2401_v49 = vadd.f32 %v4002_v51, %v4015_v9 }
 0x33c   :  { %v2355_v32 = vpop.f32.mrf.mxu0  ;;  %v2402_v39 = vpop.f32.mrf.mxu1 }
 0x33d   :  { %v2356_v56 = vadd.f32 %v2355_v32, %v4004_v54  ;;  %v2557_v11 = vpack.c.bf16 %v2354_v23, %v2350_v52  ;;  %v2403_v7 = vadd.f32 %v2402_v39, %v4015_v9 }
 0x33e   :  { %v2359_v40 = vpop.f32.mrf.mxu0  ;;  %v2404_v55 = vpop.f32.mrf.mxu1 }
 0x33f   :  { %v2360_v2 = vadd.f32 %v2359_v40, %v4000_v38  ;;  %v2558_v19 = vpack.c.bf16 %v2356_v56, %v2352_v58  ;;  %v2405_v31 = vadd.f32 %v2404_v55, %v4010_v5 }
 0x340   :  { %v2361_v6 = vpop.f32.mrf.mxu0  ;;  %v2406_v57 = vpop.f32.mrf.mxu1 }
 0x341   :  { %v2565_v59 = vpack.c.bf16 %v2360_v2, %v2360_v2  ;;  %v2362_v17 = vadd.f32 %v2361_v6, %v4000_v38  ;;  %v2407_v60 = vadd.f32 %v2406_v57, %v4010_v5  ;;  %v2551_v55 = vpack.c.bf16 %v2405_v31, %v2401_v49 }
 0x342   :  { %v2363_v53 = vpop.f32.mrf.mxu0  ;;  %v2410_v50 = vpop.f32.mrf.mxu1 }
 0x343   :  { %3156 = vtanh.bf16 %v2565_v59  ;;  %v2566_v3 = vpack.c.bf16 %v2362_v17, %v2362_v17  ;;  %v2411_v30 = vadd.f32 %v2410_v50, %v4006_v12  ;;  %v2552_v18 = vpack.c.bf16 %v2407_v60, %v2403_v7 }
 0x344   :  { %v2364_v48 = vpop.f32.mrf.mxu0  ;;  %v2412_v34 = vpop.f32.mrf.mxu1 }
 0x345   :  { %3158 = vtanh.bf16 %v2566_v3  ;;  %v2413_v0 = vadd.f32 %v2412_v34, %v4006_v12 }
 0x346   :  { %v2414_v25 = vpop.f32.mrf.mxu1  ;;  %v4021_v41 = vpop.f32.mrf.mxu0  ;;  %3160 = vtanh.bf16 %v2558_v19 }
 0x347   :  { %3162 = vtanh.bf16 %v2557_v11  ;;  %v2415_v35 = vadd.f32 %v2414_v25, %v4004_v54 }
 0x348   :  { %v2416_v33 = vpop.f32.mrf.mxu1  ;;  %v4024_v1 = vpop.f32.mrf.mxu0  ;;  %3164 = vtanh.bf16 %v2550_v29  ;;  %v4057_v29 = vld [vmem:[%s4156_s7] sm:$0xff]  }
 0x349   :  { %v2417_v4 = vadd.f32 %v2416_v33, %v4004_v54  ;;  %3166 = vtanh.bf16 %v2549_v61  ;;  %v2559_v15 = vpack.c.bf16 %v2415_v35, %v2411_v30  ;;  %v2464_v61 = vadd.f32 %v4024_v1, %v4015_v9 }
 0x34a   :  { %v2420_v42 = vpop.f32.mrf.mxu1  ;;  %v4026_v28 = vpop.f32.mrf.mxu0 }
 0x34b   :  { %v2421_v43 = vadd.f32 %v2420_v42, %v4000_v38  ;;  %v2560_v62 = vpack.c.bf16 %v2417_v4, %v2413_v0  ;;  %v2466_v42 = vadd.f32 %v4026_v28, %v4010_v5  ;;  %v2462_v0 = vadd.f32 %v4021_v41, %v4015_v9 }
 0x34c   :  { %v2422_v47 = vpop.f32.mrf.mxu1  ;;  %v2467_v21 = vpop.f32.mrf.mxu0 }
 0x34d   :  { %v2567_v14 = vpack.c.bf16 %v2421_v43, %v2421_v43  ;;  %v2423_v44 = vadd.f32 %v2422_v47, %v4000_v38  ;;  %v2468_v48 = vadd.f32 %v2467_v21, %v4010_v5  ;;  %v2553_v28 = vpack.c.bf16 %v2466_v42, %v2462_v0 }
 0x34e   :  { %v2424_v26 = vpop.f32.mrf.mxu1  ;;  %v2471_v36 = vpop.f32.mrf.mxu0 }
 0x34f   :  { %3168 = vtanh.bf16 %v2567_v14  ;;  %v2568_v16 = vpack.c.bf16 %v2423_v44, %v2423_v44  ;;  %v2472_v11 = vadd.f32 %v2471_v36, %v4006_v12  ;;  %v2554_v21 = vpack.c.bf16 %v2468_v48, %v2464_v61 }
 0x350   :  { %v2425_v22 = vpop.f32.mrf.mxu1  ;;  %v2473_v63 = vpop.f32.mrf.mxu0 }
 0x351   :  { %v3157_v46 = vpop.eup %3156  ;;  %3170 = vtanh.bf16 %v2568_v16  ;;  %v2474_v53 = vadd.f32 %v2473_v63, %v4006_v12 }
 0x352   :  { %v2475_v20 = vpop.f32.mrf.mxu0  ;;  %v4037_v45 = vpop.f32.mrf.mxu1  ;;  %3172 = vtanh.bf16 %v2560_v62  ;;  %v2644_v39 = vsel %vm2642_vm6, %v3157_v46, 0  ;;  %v4075_v62 = vld [vmem:[%s4156_s7 + $0x8] sm:$0x1f]  }
 0x353   :  { %v3159_v37 = vpop.eup %3158  ;;  %3174 = vtanh.bf16 %v2559_v15  ;;  %v2476_v19 = vadd.f32 %v2475_v20, %v4004_v54 }
 0x354   :  { %v2477_v32 = vpop.f32.mrf.mxu0  ;;  %v4041_v40 = vpop.f32.mrf.mxu1  ;;  %3053 = vmatprep.subr.msk.bf16.mxu0 %vm2642_vm6, %v3159_v37  ;;  %3176 = vtanh.bf16 %v2552_v18 }
 0x355   :  { %v3161_v56 = vpop.eup %3160  ;;  %2678 = vmatpush1.bf16.msra.mxu0 %v2644_v39  ;;  %v2478_v57 = vadd.f32 %v2477_v32, %v4004_v54  ;;  %3178 = vtanh.bf16 %v2551_v55  ;;  %v2561_v4 = vpack.c.bf16 %v2476_v19, %v2472_v11 }
 0x356   :  { %v2481_v2 = vpop.f32.mrf.mxu0  ;;  %v4045_v6 = vpop.f32.mrf.mxu1  ;;  %2679 = vmatprep.subr.bf16.mxu0 %v3161_v56 }
 0x357   :  { %v2482_v51 = vadd.f32 %v2481_v2, %v4000_v38  ;;  %v3163_v58 = vpop.eup %3162  ;;  %v2562_v34 = vpack.c.bf16 %v2478_v57, %v2474_v53 }
 0x358   :  { %v2483_v59 = vpop.f32.mrf.mxu0  ;;  %v2528_v17 = vpop.f32.mrf.mxu1 }
 0x359   :  { %v3165_v23 = vpop.eup %3164  ;;  %v2569_v50 = vpack.c.bf16 %v2482_v51, %v2482_v51  ;;  %v2484_v27 = vadd.f32 %v2483_v59, %v4000_v38  ;;  %2680 = vmatpush1.bf16.msra.mxu0 %v3163_v58  ;;  %v2529_v31 = vadd.f32 %v2528_v17, %v4010_v5 }
 0x35a   :  { %v2532_v3 = vpop.f32.mrf.mxu1  ;;  %2681 = vmatprep.subr.bf16.mxu0 %v3165_v23  ;;  %v2485_v52 = vpop.f32.mrf.mxu0 }
 0x35b   :  { %3180 = vtanh.bf16 %v2569_v50  ;;  %v2570_v8 = vpack.c.bf16 %v2484_v27, %v2484_v27  ;;  %v3167_v24 = vpop.eup %3166  ;;  %v2533_v18 = vadd.f32 %v2532_v3, %v4006_v12 }
 0x35c   :  { %v2534_v25 = vpop.f32.mrf.mxu1  ;;  %v2486_v10 = vpop.f32.mrf.mxu0 }
 0x35d   :  { %v3169_v33 = vpop.eup %3168  ;;  %3182 = vtanh.bf16 %v2570_v8  ;;  %2682 = vmatpush1.bf16.msra.mxu0 %v3167_v24  ;;  %v2535_v30 = vadd.f32 %v2534_v25, %v4006_v12  ;;  %v2523_v12 = vadd.f32 %v4037_v45, %v4015_v9 }
 0x35e   :  { %v2536_v43 = vpop.f32.mrf.mxu1  ;;  %3184 = vtanh.bf16 %v2562_v34  ;;  %v2650_v1 = vsel %vm2642_vm6, %v3169_v33, 0 }
 0x35f   :  { %v3171_v47 = vpop.eup %3170  ;;  %3186 = vtanh.bf16 %v2561_v4  ;;  %v2537_v46 = vadd.f32 %v2536_v43, %v4004_v54  ;;  %v2613_v43 = vpop.permute.xlu1 %2612 }
 0x360   :  { %v2538_v14 = vpop.f32.mrf.mxu1  ;;  %3054 = vmatmul.mubr.msk.bf16.vlgmr.msra.gmra.mxu0 %vm2635_vm7, %v4057_v29  ;;  %3056 = vmatprep.subr.msk.bf16.mxu1 %vm2642_vm6, %v3171_v47  ;;  %v3173_v44 = vpop.eup %3172  ;;  %3188 = vtanh.bf16 %v2554_v21 }
 0x361   :  { %2731 = vmatpush1.bf16.msra.mxu1 %v2650_v1  ;;  %2709 = vmatprep.mubr.bf16.mxu0 %v4204_v13  ;;  %v2539_v26 = vadd.f32 %v2538_v14, %v4004_v54  ;;  %v3175_v36 = vpop.eup %3174  ;;  %3190 = vtanh.bf16 %v2553_v28  ;;  %v2527_v54 = vadd.f32 %v4045_v6, %v4010_v5  ;;  %v2563_v39 = vpack.c.bf16 %v2537_v46, %v2533_v18 }
 0x362   :  { %v2542_v35 = vpop.f32.mrf.mxu1  ;;  %2732 = vmatprep.subr.bf16.mxu1 %v3173_v44  ;;  %v3177_v16 = vpop.eup %3176 }
 0x363   :  { %v2543_v41 = vadd.f32 %v2542_v35, %v4000_v38  ;;  %v2564_v15 = vpack.c.bf16 %v2539_v26, %v2535_v30  ;;  %v3179_v37 = vpop.eup %3178  ;;  %v2555_v57 = vpack.c.bf16 %v2527_v54, %v2523_v12 }
 0x364   :  { %v2544_v60 = vpop.f32.mrf.mxu1 }
 0x365   :  { %v2571_v22 = vpack.c.bf16 %v2543_v41, %v2543_v41  ;;  %v2545_v63 = vadd.f32 %v2544_v60, %v4000_v38  ;;  %2733 = vmatpush1.bf16.msra.mxu1 %v3175_v36  ;;  %v2525_v38 = vadd.f32 %v4041_v40, %v4015_v9 }
 0x366   :  { %v2546_v7 = vpop.f32.mrf.mxu1  ;;  %2734 = vmatprep.subr.bf16.mxu1 %v3177_v16 }
 0x367   :  { %3192 = vtanh.bf16 %v2571_v22  ;;  %v2572_v20 = vpack.c.bf16 %v2545_v63, %v2545_v63  ;;  %v2556_v55 = vpack.c.bf16 %v2529_v31, %v2525_v38 }
 0x368   :  { %v2547_v49 = vpop.f32.mrf.mxu1  ;;  %3055 = vmatmul.mubr.msk.bf16.gmra.mxu0 %vm2635_vm7, %v4075_v62 }
 0x369   :  { %v3181_v32 = vpop.eup %3180  ;;  %3194 = vtanh.bf16 %v2572_v20  ;;  %2735 = vmatpush1.bf16.msra.mxu1 %v3179_v37  ;;  %2805 = vmatprep.mubr.bf16.mxu0 %v4204_v13 }
 0x36a   :  { %3196 = vtanh.bf16 %v2564_v15  ;;  %v2656_v40 = vsel %vm2642_vm6, %v3181_v32, 0 }
 0x36b   :  { %v3183_v56 = vpop.eup %3182  ;;  %3198 = vtanh.bf16 %v2563_v39 }
 0x36c   :  { %3057 = vmatmul.mubr.msk.bf16.vlgmr.msra.gmra.mxu1 %vm2635_vm7, %v4057_v29  ;;  %3059 = vmatprep.subr.msk.bf16.mxu0 %vm2642_vm6, %v3183_v56  ;;  %v3185_v2 = vpop.eup %3184  ;;  %3200 = vtanh.bf16 %v2556_v55 }
 0x36d   :  { %2784 = vmatpush1.bf16.msra.mxu0 %v2656_v40  ;;  %2762 = vmatprep.mubr.bf16.mxu1 %v4204_v13  ;;  %v3187_v5 = vpop.eup %3186  ;;  %3202 = vtanh.bf16 %v2555_v57  ;;  %v2623_v57 = vpop.permute.xlu1 %2622 }
 0x36e   :  { %2785 = vmatprep.subr.bf16.mxu0 %v3185_v2  ;;  %v3189_v6 = vpop.eup %3188 }
 0x36f   :  { %v3191_v9 = vpop.eup %3190 }
 0x371   :  { %2786 = vmatpush1.bf16.msra.mxu0 %v3187_v5 }
 0x372   :  { %2787 = vmatprep.subr.bf16.mxu0 %v3189_v6 }
 0x374   :  { %3058 = vmatmul.mubr.msk.bf16.gmra.mxu1 %vm2635_vm7, %v4075_v62 }
 0x375   :  { %v3193_v45 = vpop.eup %3192  ;;  %2788 = vmatpush1.bf16.msra.mxu0 %v3191_v9  ;;  %2858 = vmatprep.mubr.bf16.mxu1 %v4204_v13 }
 0x376   :  { %v2662_v58 = vsel %vm2642_vm6, %v3193_v45, 0 }
 0x377   :  { %v3195_v51 = vpop.eup %3194 }
 0x378   :  { %3060 = vmatmul.mubr.msk.bf16.vlgmr.msra.gmra.mxu0 %vm2635_vm7, %v4057_v29  ;;  %3062 = vmatprep.subr.msk.bf16.mxu1 %vm2642_vm6, %v3195_v51  ;;  %v3197_v59 = vpop.eup %3196 }
 0x379   :  { %2837 = vmatpush1.bf16.msra.mxu1 %v2662_v58  ;;  %2815 = vmatprep.mubr.bf16.mxu0 %v4204_v13  ;;  %v3199_v17 = vpop.eup %3198 }
 0x37a   :  { %2838 = vmatprep.subr.bf16.mxu1 %v3197_v59  ;;  %v3201_v23 = vpop.eup %3200 }
 0x37b   :  { %v3203_v53 = vpop.eup %3202 }
 0x37d   :  { %2839 = vmatpush1.bf16.msra.mxu1 %v3199_v17 }
 0x37e   :  { %2840 = vmatprep.subr.bf16.mxu1 %v3201_v23 }
 0x380   :  { %3061 = vmatmul.mubr.msk.bf16.gmra.mxu0 %vm2635_vm7, %v4075_v62 }
 0x381   :  { %2841 = vmatpush1.bf16.msra.mxu1 %v3203_v53 }
 0x384   :  { %3063 = vmatmul.mubr.msk.bf16.vlgmr.msra.gmra.mxu1 %vm2635_vm7, %v4057_v29 }
 0x385   :  { %2868 = vmatprep.mubr.bf16.mxu1 %v4204_v13  ;;  %v2608_v13 = vpop.permute.xlu0 %2607 }
 0x389   :  { %v4113_v36 = vpop.permute.xlu0 %2617 }
 0x38c   :  { %3064 = vmatmul.mubr.msk.bf16.gmra.mxu1 %vm2635_vm7, %v4075_v62 }
 0x420   :  { %v2701_v50 = vpop.f32.mrf.mxu0 }
 0x421   :  { %v2702_v44 = vadd.f32 %v2701_v50, %v2608_v13 }
 0x422   :  { %v2703_v27 = vpop.f32.mrf.mxu0 }
 0x423   :  { %v2704_v47 = vadd.f32 %v2703_v27, %v2608_v13  ;;  %v2879_v46 = vmax.f32 %v2702_v44, 0.0 }
 0x424   :  { %v2705_v19 = vpop.f32.mrf.mxu0 }
 0x425   :  { %v2706_v26 = vadd.f32 %v2705_v19, %v2613_v43  ;;  %v2880_v60 = vmax.f32 %v2704_v47, 0.0 }
 0x426   :  { %v2707_v3 = vpop.f32.mrf.mxu0 }
 0x427   :  { %v2708_v0 = vadd.f32 %v2707_v3, %v2613_v43  ;;  %v2887_v20 = vmax.f32 %v2706_v26, 0.0  ;;  %v2911_v32 = vadd.f32 %v2880_v60, %v2879_v46 }
 0x428   :  { %v2711_v52 = vpop.f32.mrf.mxu0 }
 0x429   :  { %v2888_v30 = vmax.f32 %v2708_v0, 0.0  ;;  %v4116_v22 = vadd.f32 %v2711_v52, %v4113_v36 }
 0x42a   :  { %v2713_v34 = vpop.f32.mrf.mxu0 }
 0x42b   :  { %v4119_v7 = vadd.f32 %v2713_v34, %v4113_v36  ;;  %v2912_v56 = vadd.f32 %v2888_v30, %v2887_v20  ;;  %v2895_v55 = vmax.f32 %v4116_v22, 0.0 }
 0x42c   :  { %v2754_v48 = vpop.f32.mrf.mxu1  ;;  %v2715_v11 = vpop.f32.mrf.mxu0 }
 0x42d   :  { %v2755_v28 = vadd.f32 %v2754_v48, %v2608_v13  ;;  %v2896_v5 = vmax.f32 %v4119_v7, 0.0  ;;  %v4125_v51 = vadd.f32 %v2715_v11, %v2623_v57 }
 0x42e   :  { %v2756_v8 = vpop.f32.mrf.mxu1  ;;  %v2717_v10 = vpop.f32.mrf.mxu0 }
 0x42f   :  { %v2757_v21 = vadd.f32 %v2756_v8, %v2608_v13  ;;  %v2881_v31 = vmax.f32 %v2755_v28, 0.0  ;;  %v4127_v58 = vadd.f32 %v2717_v10, %v2623_v57 }
 0x430   :  { %v2758_v24 = vpop.f32.mrf.mxu1 }
 0x431   :  { %v2882_v62 = vmax.f32 %v2757_v21, 0.0  ;;  %v2759_v16 = vadd.f32 %v2758_v24, %v2613_v43 }
 0x432   :  { %v2760_v25 = vpop.f32.mrf.mxu1 }
 0x433   :  { %v2761_v35 = vadd.f32 %v2760_v25, %v2613_v43  ;;  %v2915_v38 = vadd.f32 %v2882_v62, %v2881_v31  ;;  %v2889_v54 = vmax.f32 %v2759_v16, 0.0 }
 0x434   :  { %v2764_v33 = vpop.f32.mrf.mxu1 }
 0x435   :  { %v2890_v15 = vmax.f32 %v2761_v35, 0.0  ;;  %v2765_v9 = vadd.f32 %v2764_v33, %v4113_v36  ;;  %v2927_v50 = vadd.f32 %v2915_v38, %v2911_v32 }
 0x436   :  { %v2766_v29 = vpop.f32.mrf.mxu1 }
 0x437   :  { %v2767_v39 = vadd.f32 %v2766_v29, %v4113_v36  ;;  %v2916_v6 = vadd.f32 %v2890_v15, %v2889_v54  ;;  %v2897_v33 = vmax.f32 %v2765_v9, 0.0 }
 0x438   :  { %v2807_v61 = vpop.f32.mrf.mxu0  ;;  %v4111_v14 = vpop.f32.mrf.mxu1 }
 0x439   :  { %v2808_v12 = vadd.f32 %v2807_v61, %v2608_v13  ;;  %v2898_v27 = vmax.f32 %v2767_v39, 0.0  ;;  %v2928_v25 = vadd.f32 %v2916_v6, %v2912_v56  ;;  %v2769_v35 = vadd.f32 %v4111_v14, %v2623_v57 }
 0x43a   :  { %v2809_v42 = vpop.f32.mrf.mxu0  ;;  %v2770_v63 = vpop.f32.mrf.mxu1  ;;  %v2904_v14 = vmax.f32 %v4127_v58, 0.0 }
 0x43b   :  { %v2810_v37 = vadd.f32 %v2809_v42, %v2608_v13  ;;  %v2883_v52 = vmax.f32 %v2808_v12, 0.0  ;;  %v2771_v10 = vadd.f32 %v2770_v63, %v2623_v57  ;;  %v2917_v28 = vadd.f32 %v2898_v27, %v2897_v33 }
 0x43c   :  { %v2811_v4 = vpop.f32.mrf.mxu0  ;;  %v2905_v32 = vmax.f32 %v2769_v35, 0.0 }
 0x43d   :  { %v2884_v59 = vmax.f32 %v2810_v37, 0.0  ;;  %v2812_v19 = vadd.f32 %v2811_v4, %v2613_v43 }
 0x43e   :  { %v2813_v1 = vpop.f32.mrf.mxu0 }
 0x43f   :  { %v2814_v45 = vadd.f32 %v2813_v1, %v2613_v43  ;;  %v2919_v29 = vadd.f32 %v2884_v59, %v2883_v52  ;;  %v2891_v0 = vmax.f32 %v2812_v19, 0.0 }
 0x440   :  { %v2817_v41 = vpop.f32.mrf.mxu0 }
 0x441   :  { %v2892_v11 = vmax.f32 %v2814_v45, 0.0  ;;  %v2818_v42 = vadd.f32 %v2817_v41, %v4113_v36  ;;  %v2906_v41 = vmax.f32 %v2771_v10, 0.0 }
 0x442   :  { %v2819_v18 = vpop.f32.mrf.mxu0 }
 0x443   :  { %v2820_v48 = vadd.f32 %v2819_v18, %v4113_v36  ;;  %v2920_v16 = vadd.f32 %v2892_v11, %v2891_v0  ;;  %v2899_v63 = vmax.f32 %v2818_v42, 0.0  ;;  %v2918_v6 = vadd.f32 %v2906_v41, %v2905_v32 }
 0x444   :  { %v2860_v49 = vpop.f32.mrf.mxu1  ;;  %v2821_v17 = vpop.f32.mrf.mxu0 }
 0x445   :  { %v2861_v40 = vadd.f32 %v2860_v49, %v2608_v13  ;;  %v2900_v26 = vmax.f32 %v2820_v48, 0.0  ;;  %v2822_v46 = vadd.f32 %v2821_v17, %v2623_v57  ;;  %v2913_v49 = vadd.f32 %v2896_v5, %v2895_v55 }
 0x446   :  { %v2862_v2 = vpop.f32.mrf.mxu1 }
 0x447   :  { %v2863_v23 = vadd.f32 %v2862_v2, %v2608_v13  ;;  %v2885_v34 = vmax.f32 %v2861_v40, 0.0  ;;  %v2823_v13 = vpop.f32.mrf.mxu0  ;;  %v2921_v38 = vadd.f32 %v2900_v26, %v2899_v63  ;;  %v2903_v40 = vmax.f32 %v4125_v51, 0.0 }
 0x448   :  { %v2864_v53 = vpop.f32.mrf.mxu1  ;;  %v2929_v2 = vadd.f32 %v2917_v28, %v2913_v49  ;;  %v2907_v9 = vmax.f32 %v2822_v46, 0.0 }
 0x449   :  { %v2865_v3 = vadd.f32 %v2864_v53, %v2613_v43  ;;  %v2886_v8 = vmax.f32 %v2863_v23, 0.0  ;;  %v2914_v58 = vadd.f32 %v2904_v14, %v2903_v40 }
 0x44a   :  { %v2866_v24 = vpop.f32.mrf.mxu1 }
 0x44b   :  { %v2867_v61 = vadd.f32 %v2866_v24, %v2613_v43  ;;  %v2923_v47 = vadd.f32 %v2886_v8, %v2885_v34  ;;  %v2893_v4 = vmax.f32 %v2865_v3, 0.0  ;;  %v2824_v43 = vadd.f32 %v2823_v13, %v2623_v57 }
 0x44c   :  { %v2870_v21 = vpop.f32.mrf.mxu1  ;;  %v2930_v53 = vadd.f32 %v2918_v6, %v2914_v58 }
 0x44d   :  { %v2894_v1 = vmax.f32 %v2867_v61, 0.0  ;;  %v2871_v44 = vadd.f32 %v2870_v21, %v4113_v36  ;;  %v2931_v60 = vadd.f32 %v2923_v47, %v2919_v29 }
 0x44e   :  { %v2872_v62 = vpop.f32.mrf.mxu1 }
 0x44f   :  { %v2924_v30 = vadd.f32 %v2894_v1, %v2893_v4  ;;  %v2873_v22 = vadd.f32 %v2872_v62, %v4113_v36  ;;  %v2935_v7 = vadd.f32 %v2931_v60, %v2927_v50  ;;  %v2901_v20 = vmax.f32 %v2871_v44, 0.0 }
 0x450   :  { %v2874_v31 = vpop.f32.mrf.mxu1  ;;  %v2908_v36 = vmax.f32 %v2824_v43, 0.0 }
 0x451   :  { %v2932_v15 = vadd.f32 %v2924_v30, %v2920_v16  ;;  %v2902_v37 = vmax.f32 %v2873_v22, 0.0  ;;  %v2875_v18 = vadd.f32 %v2874_v31, %v2623_v57  ;;  %2939 = vst [vmem:[%s4157_s9] sm:$0xff] %v2935_v7 }
 0x452   :  { %v2876_v54 = vpop.f32.mrf.mxu1  ;;  %v2922_v59 = vadd.f32 %v2908_v36, %v2907_v9 }
 0x453   :  { %v2936_v39 = vadd.f32 %v2932_v15, %v2928_v25  ;;  %v2925_v56 = vadd.f32 %v2902_v37, %v2901_v20  ;;  %v2877_v12 = vadd.f32 %v2876_v54, %v2623_v57  ;;  %v2909_v5 = vmax.f32 %v2875_v18, 0.0 }
 0x455   :  { %2940 = vst [vmem:[%s4157_s9 + $0x8] sm:$0xff] %v2936_v39  ;;  %v2933_v55 = vadd.f32 %v2925_v56, %v2921_v38  ;;  %v2910_v45 = vmax.f32 %v2877_v12, 0.0 }
 0x457   :  { %v2937_v17 = vadd.f32 %v2933_v55, %v2929_v2  ;;  %v2926_v23 = vadd.f32 %v2910_v45, %v2909_v5 }
 0x459   :  { %2941 = vst [vmem:[%s4157_s9 + $0x10] sm:$0xff] %v2937_v17  ;;  %v2934_v57 = vadd.f32 %v2926_v23, %v2922_v59 }
 0x45b   :  { %v2938_v51 = vadd.f32 %v2934_v57, %v2930_v53 }
 0x45d   :  { %2942 = vst [vmem:[%s4157_s9 + $0x18] sm:$0x1] %v2938_v51 }

</bundles_post_ra>
